<compile_context>
chip_gen: v7x
topology: tpu7x:2x2x1
jax: 0.10.0
libtpu: 0.0.40
codegen_flags: <defaults>
</compile_context>

<pallas_src>
import math

import jax
import jax.numpy as jnp
from jax.experimental import pallas as pl
from jax.experimental.pallas import tpu as pltpu

NHIDDEN = 128   # nhidden in ALIASNorm.__init__
KS = 3          # kernel size
EPS = 1e-5      # InstanceNorm2d default eps
PAD = 128       # lane-aligned slack around the flat activation slab


def _round_up(n, m):
    return ((n + m - 1) // m) * m


def _phys_vmem_bytes():
    try:
        return int(pltpu.get_tpu_info().vmem_capacity_bytes)
    except Exception:
        return 64 * 2 ** 20   # conservative fallback (v7x per-TC VMEM)


# --------------------------------------------------------------------------------------
# Kernel 1: conv_shared (3x3,pad=1) + ReLU  ->  conv_gamma/conv_beta (3x3,pad=1, packed),
#           all channel-major, activation kept in VMEM; plus per-row-tile partial stats.
# --------------------------------------------------------------------------------------
def _make_conv_gb_kernel(TH, W, C):
    FLATP = (TH + 2) * W      # activation positions per tile (1-row halo top + bottom)
    THW = TH * W

    def kernel(patch_ref, x_ref, r_ref, scale_ref, wsT_ref, bs_ref, wgbT_ref,
               bgb_ref, mask_ref, gb_ref, ps_ref, a_ref):
        t = pl.program_id(1)
        nt = pl.num_programs(1)

        # ---- partial InstanceNorm stats of (x + noise): one-pass sum / sum-of-squares ----
        # TODO(synk): one-pass E[x^2]-mean^2 can lose precision for large-mean inputs.
        xn = x_ref[0].astype(jnp.float32) + r_ref[0] * scale_ref[...]        # (C, THW)
        ps_ref[0, 0] = jnp.concatenate(
            [jnp.sum(xn, axis=1, keepdims=True),
             jnp.sum(xn * xn, axis=1, keepdims=True)], axis=1)               # (C, 2)

        # ---- conv_shared + ReLU as one channel-major matmul (bf16 operands, f32 acc) ----
        actv = jnp.dot(wsT_ref[...], patch_ref[0, 0],
                       preferred_element_type=jnp.float32)                   # (128, FLATP)
        actv = jnp.maximum(actv + bs_ref[...], 0.0).astype(jnp.bfloat16)

        # ---- place activation in the flat VMEM scratch (lane-aligned center store) ----
        zslab = jnp.zeros((NHIDDEN, PAD), jnp.bfloat16)
        a_ref[:, 0:PAD] = zslab                                  # front slack (read by taps)
        a_ref[:, PAD + FLATP:PAD + FLATP + PAD] = zslab          # end slack
        a_ref[:, PAD:PAD + FLATP] = actv
        zrow = jnp.zeros((NHIDDEN, W), jnp.bfloat16)

        @pl.when(t == 0)
        def _zero_top():                                         # activation row above image
            a_ref[:, PAD:PAD + W] = zrow

        @pl.when(t == nt - 1)
        def _zero_bottom():                                      # activation row below image
            a_ref[:, PAD + (TH + 1) * W:PAD + FLATP] = zrow

        # ---- conv_gamma + conv_beta: 9 accumulating K=128 dots, channel-major output ----
        masks = mask_ref[...]                                    # (2, THW) bf16
        mask_l = masks[0:1]                                      # zero where col == 0
        mask_r = masks[1:2]                                      # zero where col == W-1
        acc = jnp.zeros((2 * C, THW), jnp.float32)
        for kh in range(KS):
            for kw in range(KS):
                off = PAD + kh * W + kw - 1
                sl = a_ref[:, off:off + THW]                     # (128, THW) bf16
                if kw == 0:
                    sl = sl * mask_l                             # fix left-edge column wrap
                elif kw == 2:
                    sl = sl * mask_r                             # fix right-edge column wrap
                acc = acc + jnp.dot(wgbT_ref[kh * KS + kw], sl,
                                    preferred_element_type=jnp.float32)
        gb_ref[0] = (acc + bgb_ref[...]).astype(gb_ref.dtype)    # (2C, THW), gamma then beta

    return kernel


# --------------------------------------------------------------------------------------
# Kernel 2: InstanceNorm2d(affine=False) of (x + noise) + FiLM modulation, channel-major.
# --------------------------------------------------------------------------------------
def _make_norm_mod_kernel(H, W, C):
    inv_n = 1.0 / float(H * W)

    def kernel(ps_ref, x_ref, r_ref, scale_ref, gb_ref, out_ref):
        tot = jnp.sum(ps_ref[0], axis=0)                                     # (C, 2)
        mean = tot[:, 0:1] * inv_n
        var = jnp.maximum(tot[:, 1:2] * inv_n - mean * mean, 0.0)
        rstd = jax.lax.rsqrt(var + EPS)

        xn = x_ref[0].astype(jnp.float32) + r_ref[0] * scale_ref[...]        # (C, T2W)
        gbv = gb_ref[0].astype(jnp.float32)                                  # (2C, T2W)
        gamma = gbv[:C]
        beta = gbv[C:]
        out_ref[0] = ((xn - mean) * rstd * (1.0 + gamma) + beta).astype(out_ref.dtype)

    return kernel


# --------------------------------------------------------------------------------------
# Tile selection / VMEM budgeting (generation-aware)
# --------------------------------------------------------------------------------------
def _valid_tiles(H, W):
    return [d for d in range(1, H + 1) if H % d == 0 and ((d * W) % 128 == 0 or d == H)]


def _k1_vmem_estimate(TH, W, C, KP):
    FLATP = (TH + 2) * W
    THW = TH * W
    lane = lambda n: _round_up(n, 128)
    sub = lambda n: _round_up(n, 8)
    bf16, f32 = 2, 4
    blocks = 2 * (sub(KP) * lane(FLATP) * bf16            # seg im2col patches
                  + sub(C) * lane(THW) * f32              # x
                  + sub(1) * lane(THW) * f32              # noise field
                  + sub(2 * C) * lane(THW) * bf16         # gamma/beta out
                  + sub(C) * lane(2) * f32)               # partial stats out
    consts = (sub(NHIDDEN) * lane(KP) * bf16 + sub(NHIDDEN) * lane(1) * f32
              + KS * KS * sub(2 * C) * lane(NHIDDEN) * bf16
              + sub(2 * C) * lane(1) * f32 + sub(2) * lane(THW) * bf16
              + sub(C) * lane(1) * f32)
    scratch = NHIDDEN * lane(FLATP + 2 * PAD) * bf16
    temps = (sub(NHIDDEN) * lane(FLATP) * f32
             + 2 * sub(2 * C) * lane(THW) * f32
             + 2 * sub(C) * lane(THW) * f32
             + sub(NHIDDEN) * lane(THW) * bf16)
    return blocks + consts + scratch + temps


def _k2_vmem_estimate(TH2, W, C, nT1):
    T2W = TH2 * W
    lane = lambda n: _round_up(n, 128)
    sub = lambda n: _round_up(n, 8)
    bf16, f32 = 2, 4
    blocks = 2 * (sub(C) * lane(T2W) * f32 * 2             # x + out
                  + sub(1) * lane(T2W) * f32
                  + sub(2 * C) * lane(T2W) * bf16
                  + nT1 * sub(C) * lane(2) * f32)
    temps = 3 * sub(C) * lane(T2W) * f32 + sub(2 * C) * lane(T2W) * f32
    return blocks + temps


def _pick_tile_rows_k1(H, W, C, KP, budget, requested=None):
    cands = _valid_tiles(H, W)
    if requested is not None:
        assert requested in cands, "tile_rows must divide H with tile_rows*W % 128 == 0"
        return requested
    fit = [d for d in cands if _k1_vmem_estimate(d, W, C, KP) <= budget]
    # best effort: if nothing fits the budget take the SMALLEST valid tile (never silently
    # jump to the full image like the old fallback did).
    return max(fit) if fit else min(cands)


def _pick_tile_rows_k2(H, W, C, nT1, budget):
    cands = _valid_tiles(H, W)
    fit = [d for d in cands if _k2_vmem_estimate(d, W, C, nT1) <= budget]
    return max(fit) if fit else min(cands)


# --------------------------------------------------------------------------------------
# Parameters / wrapper
# --------------------------------------------------------------------------------------
def init_alias_norm_params(key, norm_nc, label_nc):
    """Deterministic parameter init matching the module's shapes (HWIO conv weights)."""
    def conv_init(k, cin, cout):
        fan_in = cin * KS * KS
        bound = 1.0 / math.sqrt(fan_in)        # PyTorch Conv2d default init bound
        k_w, k_b = jax.random.split(k)
        w = jax.random.uniform(k_w, (KS, KS, cin, cout), jnp.float32, -bound, bound)
        b = jax.random.uniform(k_b, (cout,), jnp.float32, -bound, bound)
        return w, b

    k_s, k_g, k_b = jax.random.split(key, 3)
    w_shared, b_shared = conv_init(k_s, label_nc, NHIDDEN)
    w_gamma, b_gamma = conv_init(k_g, NHIDDEN, norm_nc)
    w_beta, b_beta = conv_init(k_b, NHIDDEN, norm_nc)
    return {
        "noise_scale": jnp.zeros((norm_nc,), jnp.float32),  # nn.Parameter(zeros)
        "w_shared": w_shared, "b_shared": b_shared,
        "w_gamma": w_gamma, "b_gamma": b_gamma,
        "w_beta": w_beta, "b_beta": b_beta,
    }


def alias_norm_forward(params, x_nchw, seg_nchw, noise_key, tile_rows=None):
    """ALIASNorm('aliasinstance', C, Cs).forward(x, seg, misalign_mask=None)."""
    # TODO(synk): only the 'aliasinstance' / misalign_mask=None path is implemented
    # ('aliasbatch' and the MaskNorm 'aliasmask' variants are not built).
    B, C, H, W = x_nchw.shape
    Cs = seg_nchw.shape[1]
    HW = H * W
    KP = _round_up(KS * KS * Cs, 32)           # im2col K, padded for bf16 MXU packing

    phys = _phys_vmem_bytes()
    budget = int(0.45 * phys)
    TH = _pick_tile_rows_k1(H, W, C, KP, budget, tile_rows)
    nT = H // TH
    THW = TH * W
    TH2 = _pick_tile_rows_k2(H, W, C, nT, budget)   # kernel 2 gets its own (larger) block
    nT2 = H // TH2
    T2W = TH2 * W

    # ---- XLA glue (reshapes of x/out are free; no NHWC transposes of x or out) ----
    x_flat = x_nchw.reshape(B, C, HW)

    # noise = (randn(b, w, h, 1) * noise_scale).transpose(1, 3); the random field depends
    # only on (b, h, w) -- per-channel scaling happens inside the kernels.
    rnd = jax.random.normal(noise_key, (B, W, H), jnp.float32)
    r_flat = jnp.transpose(rnd, (0, 2, 1)).reshape(B, 1, HW)
    scale_col = params["noise_scale"].reshape(C, 1).astype(jnp.float32)

    # seg im2col patches, channel-major, per-row-tile overlapping slabs (wrapper-side packing)
    seg_pad = jnp.pad(seg_nchw.astype(jnp.float32), ((0, 0), (0, 0), (2, 2), (1, 1)))
    taps = [seg_pad[:, :, kh:kh + H + 2, kw:kw + W]
            for kh in range(KS) for kw in range(KS)]
    P = jnp.concatenate(taps, axis=1)                                        # (B, 9*Cs, H+2, W)
    P = jnp.pad(P, ((0, 0), (0, KP - KS * KS * Cs), (0, 0), (0, 0)))
    slabs = jnp.stack([P[:, :, t * TH:t * TH + TH + 2, :] for t in range(nT)], axis=1)
    patches = slabs.reshape(B, nT, KP, (TH + 2) * W).astype(jnp.bfloat16)

    # packed / transposed conv parameters (bf16 MXU operands, f32 biases)
    wsT = jnp.transpose(params["w_shared"].reshape(KS * KS * Cs, NHIDDEN))
    wsT = jnp.pad(wsT, ((0, 0), (0, KP - KS * KS * Cs))).astype(jnp.bfloat16)  # (128, KP)
    bs_col = params["b_shared"].reshape(NHIDDEN, 1).astype(jnp.float32)
    wgb = jnp.concatenate([params["w_gamma"], params["w_beta"]], axis=-1)      # (3,3,128,2C)
    wgbT = jnp.transpose(wgb.reshape(KS * KS, NHIDDEN, 2 * C), (0, 2, 1)).astype(jnp.bfloat16)
    bgb_col = jnp.concatenate(
        [params["b_gamma"], params["b_beta"]]).reshape(2 * C, 1).astype(jnp.float32)

    # edge masks for the +/-1-column conv taps (zero the wrapped positions)
    col = jnp.arange(THW, dtype=jnp.int32) % W
    masks = jnp.stack([(col != 0), (col != W - 1)], axis=0).astype(jnp.bfloat16)  # (2, THW)

    est1 = _k1_vmem_estimate(TH, W, C, KP)
    est2 = _k2_vmem_estimate(TH2, W, C, nT)
    cap = int(0.70 * phys)
    cp1 = pltpu.CompilerParams(dimension_semantics=("parallel", "parallel"),
                               vmem_limit_bytes=int(min(cap, max(2 * est1, 32 * 2 ** 20))))
    cp2 = pltpu.CompilerParams(dimension_semantics=("parallel", "parallel"),
                               vmem_limit_bytes=int(min(cap, max(2 * est2, 16 * 2 ** 20))))

    # ---- kernel 1: fused convs (activation stays in VMEM) + partial InstanceNorm stats ----
    gb, pstats = pl.pallas_call(
        _make_conv_gb_kernel(TH, W, C),
        out_shape=(jax.ShapeDtypeStruct((B, 2 * C, HW), jnp.bfloat16),
                   jax.ShapeDtypeStruct((B, nT, C, 2), jnp.float32)),
        grid=(B, nT),
        in_specs=[
            pl.BlockSpec((1, 1, KP, (TH + 2) * W), lambda b, t: (b, t, 0, 0)),
            pl.BlockSpec((1, C, THW), lambda b, t: (b, 0, t)),
            pl.BlockSpec((1, 1, THW), lambda b, t: (b, 0, t)),
            pl.BlockSpec((C, 1), lambda b, t: (0, 0)),
            pl.BlockSpec((NHIDDEN, KP), lambda b, t: (0, 0)),
            pl.BlockSpec((NHIDDEN, 1), lambda b, t: (0, 0)),
            pl.BlockSpec((KS * KS, 2 * C, NHIDDEN), lambda b, t: (0, 0, 0)),
            pl.BlockSpec((2 * C, 1), lambda b, t: (0, 0)),
            pl.BlockSpec((2, THW), lambda b, t: (0, 0)),
        ],
        out_specs=(
            pl.BlockSpec((1, 2 * C, THW), lambda b, t: (b, 0, t)),
            pl.BlockSpec((1, 1, C, 2), lambda b, t: (b, t, 0, 0)),
        ),
        scratch_shapes=[pltpu.VMEM((NHIDDEN, (TH + 2) * W + 2 * PAD), jnp.bfloat16)],
        compiler_params=cp1,
    )(patches, x_flat, r_flat, scale_col, wsT, bs_col, wgbT, bgb_col, masks)

    # ---- kernel 2: InstanceNorm(x + noise) + FiLM modulation, flattened NCHW in/out ----
    # TODO(synk): on 128 MiB parts (v5e/v6e) kernel 1+2 could be fused to drop the gb HBM
    # round-trip when 2*C*HW fits VMEM; kept two-pass so the same code also fits v7x.
    out_flat = pl.pallas_call(
        _make_norm_mod_kernel(H, W, C),
        out_shape=jax.ShapeDtypeStruct((B, C, HW), x_nchw.dtype),
        grid=(B, nT2),
        in_specs=[
            pl.BlockSpec((1, nT, C, 2), lambda b, t: (b, 0, 0, 0)),
            pl.BlockSpec((1, C, T2W), lambda b, t: (b, 0, t)),
            pl.BlockSpec((1, 1, T2W), lambda b, t: (b, 0, t)),
            pl.BlockSpec((C, 1), lambda b, t: (0, 0)),
            pl.BlockSpec((1, 2 * C, T2W), lambda b, t: (b, 0, t)),
        ],
        out_specs=pl.BlockSpec((1, C, T2W), lambda b, t: (b, 0, t)),
        compiler_params=cp2,
    )(pstats, x_flat, r_flat, scale_col, gb)

    return out_flat.reshape(B, C, H, W)


if __name__ == "__main__":
    B, norm_nc, label_nc, H, W = 2, 4, 3, 16, 16
    key = jax.random.PRNGKey(0)
    k_param, k_x, k_seg, k_noise = jax.random.split(key, 4)

    params = init_alias_norm_params(k_param, norm_nc, label_nc)
    x = jax.random.normal(k_x, (B, norm_nc, H, W), jnp.float32)
    seg = jax.random.normal(k_seg, (B, label_nc, H, W), jnp.float32)

    # tile_rows=8 -> 2 row tiles in kernel 1 (exercises the halo + partial-stats paths);
    # kernel 2 picks its own full-image block.
    out = alias_norm_forward(params, x, seg, k_noise, tile_rows=8)
    jax.block_until_ready(out)
    assert out.shape == (B, norm_nc, H, W) and out.dtype == jnp.float32
    print("KERNEL_OK")
</pallas_src>

<mosaic_0001>
module attributes {stable_mosaic.version = 11 : i64} {
  func.func @kernel(%arg0: i32, %arg1: i32, %arg2: memref<1x1x32x160xbf16, #tpu.memory_space<vmem>>, %arg3: memref<1x4x128xf32, #tpu.memory_space<vmem>>, %arg4: memref<1x1x128xf32, #tpu.memory_space<vmem>>, %arg5: memref<4x1xf32, #tpu.memory_space<vmem>>, %arg6: memref<128x32xbf16, #tpu.memory_space<vmem>>, %arg7: memref<128x1xf32, #tpu.memory_space<vmem>>, %arg8: memref<9x8x128xbf16, #tpu.memory_space<vmem>>, %arg9: memref<8x1xf32, #tpu.memory_space<vmem>>, %arg10: memref<2x128xbf16, #tpu.memory_space<vmem>>, %arg11: memref<1x8x128xbf16, #tpu.memory_space<vmem>>, %arg12: memref<1x1x4x2xf32, #tpu.memory_space<vmem>>, %arg13: memref<128x416xbf16, #tpu.memory_space<vmem>>) attributes {dimension_semantics = [#tpu.dimension_semantics<parallel>, #tpu.dimension_semantics<parallel>], iteration_bounds = array<i64: 2, 2>, scalar_prefetch = 0 : i64, scratch_operands = 1 : i64, tpu.core_type = #tpu.core_type<tc>, window_params = [{transform_indices = @transform_0, window_bounds = array<i64: 1, 1, 32, 160>}, {transform_indices = @transform_1, window_bounds = array<i64: 1, 4, 128>}, {transform_indices = @transform_2, window_bounds = array<i64: 1, 1, 128>}, {pipeline_mode = #tpu.pipeline_mode<synchronous>, transform_indices = @transform_3, window_bounds = array<i64: 4, 1>}, {pipeline_mode = #tpu.pipeline_mode<synchronous>, transform_indices = @transform_4, window_bounds = array<i64: 128, 32>}, {pipeline_mode = #tpu.pipeline_mode<synchronous>, transform_indices = @transform_5, window_bounds = array<i64: 128, 1>}, {pipeline_mode = #tpu.pipeline_mode<synchronous>, transform_indices = @transform_6, window_bounds = array<i64: 9, 8, 128>}, {pipeline_mode = #tpu.pipeline_mode<synchronous>, transform_indices = @transform_7, window_bounds = array<i64: 8, 1>}, {pipeline_mode = #tpu.pipeline_mode<synchronous>, transform_indices = @transform_8, window_bounds = array<i64: 2, 128>}, {transform_indices = @transform_9, window_bounds = array<i64: 1, 8, 128>}, {transform_indices = @transform_10, window_bounds = array<i64: 1, 1, 4, 2>}]} {
    %c0 = arith.constant 0 : index
    %c0_0 = arith.constant 0 : index
    %c0_1 = arith.constant 0 : index
    %0 = vector.load %arg3[%c0, %c0_0, %c0_1] : memref<1x4x128xf32, #tpu.memory_space<vmem>>, vector<1x4x128xf32>
    %1 = vector.shape_cast %0 : vector<1x4x128xf32> to vector<4x128xf32>
    %c0_2 = arith.constant 0 : index
    %c0_3 = arith.constant 0 : index
    %c0_4 = arith.constant 0 : index
    %2 = vector.load %arg4[%c0_2, %c0_3, %c0_4] : memref<1x1x128xf32, #tpu.memory_space<vmem>>, vector<1x1x128xf32>
    %3 = vector.shape_cast %2 : vector<1x1x128xf32> to vector<1x128xf32>
    %c0_5 = arith.constant 0 : index
    %c0_6 = arith.constant 0 : index
    %4 = vector.load %arg5[%c0_5, %c0_6] : memref<4x1xf32, #tpu.memory_space<vmem>>, vector<4x1xf32>
    %5 = vector.broadcast %3 : vector<1x128xf32> to vector<4x128xf32>
    %6 = vector.broadcast %4 : vector<4x1xf32> to vector<4x128xf32>
    %7 = arith.mulf %5, %6 : vector<4x128xf32>
    %8 = arith.addf %1, %7 : vector<4x128xf32>
    %cst = arith.constant dense<0.000000e+00> : vector<4xf32>
    %9 = vector.multi_reduction <add>, %8, %cst [1] : vector<4x128xf32> to vector<4xf32>
    %10 = vector.shape_cast %9 : vector<4xf32> to vector<4x1xf32>
    %11 = arith.mulf %8, %8 : vector<4x128xf32>
    %cst_7 = arith.constant dense<0.000000e+00> : vector<4xf32>
    %12 = vector.multi_reduction <add>, %11, %cst_7 [1] : vector<4x128xf32> to vector<4xf32>
    %13 = vector.shape_cast %12 : vector<4xf32> to vector<4x1xf32>
    %14 = tpu.concatenate %10, %13 in 1 : vector<4x1xf32>, vector<4x1xf32> -> vector<4x2xf32>
    %c0_8 = arith.constant 0 : index
    %c0_9 = arith.constant 0 : index
    %c0_10 = arith.constant 0 : index
    %c0_11 = arith.constant 0 : index
    %15 = vector.load %arg12[%c0_8, %c0_9, %c0_10, %c0_11] : memref<1x1x4x2xf32, #tpu.memory_space<vmem>>, vector<1x1x4x2xf32>
    %16 = vector.shape_cast %15 : vector<1x1x4x2xf32> to vector<4x2xf32>
    %17 = vector.shape_cast %14 : vector<4x2xf32> to vector<1x1x4x2xf32>
    tpu.vector_store %arg12[%c0_8, %c0_9, %c0_10, %c0_11], %17 {strides = array<i32>} : memref<1x1x4x2xf32, #tpu.memory_space<vmem>>, vector<1x1x4x2xf32>,
    %c0_12 = arith.constant 0 : index
    %c0_13 = arith.constant 0 : index
    %18 = vector.load %arg6[%c0_12, %c0_13] : memref<128x32xbf16, #tpu.memory_space<vmem>>, vector<128x32xbf16>
    %c0_14 = arith.constant 0 : index
    %c0_15 = arith.constant 0 : index
    %c0_16 = arith.constant 0 : index
    %c0_17 = arith.constant 0 : index
    %19 = vector.load %arg2[%c0_14, %c0_15, %c0_16, %c0_17] : memref<1x1x32x160xbf16, #tpu.memory_space<vmem>>, vector<1x1x32x160xbf16>
    %20 = vector.shape_cast %19 : vector<1x1x32x160xbf16> to vector<32x160xbf16>
    %cst_18 = arith.constant dense<0.000000e+00> : vector<128x160xf32>
    %21 = tpu.matmul %18, %20, %cst_18 {dimension_numbers = #tpu.dot_dimension_numbers<[1], [0], [0], [1], [0, 0, 1, 1], [], []>} : vector<128x32xbf16>, vector<32x160xbf16>, vector<128x160xf32> -> vector<128x160xf32>
    %c0_19 = arith.constant 0 : index
    %c0_20 = arith.constant 0 : index
    %22 = vector.load %arg7[%c0_19, %c0_20] : memref<128x1xf32, #tpu.memory_space<vmem>>, vector<128x1xf32>
    %23 = vector.broadcast %22 : vector<128x1xf32> to vector<128x160xf32>
    %24 = arith.addf %21, %23 : vector<128x160xf32>
    %cst_21 = arith.constant 0.000000e+00 : f32
    %25 = vector.broadcast %cst_21 : f32 to vector<128x160xf32>
    %26 = arith.maximumf %24, %25 : vector<128x160xf32>
    %27 = arith.truncf %26 : vector<128x160xf32> to vector<128x160xbf16>
    %cst_22 = arith.constant 0.000000e+00 : bf16
    %28 = vector.broadcast %cst_22 : bf16 to vector<128x128xbf16>
    %c0_23 = arith.constant 0 : index
    %c0_24 = arith.constant 0 : index
    %29 = vector.load %arg13[%c0_23, %c0_24] : memref<128x416xbf16, #tpu.memory_space<vmem>>, vector<128x128xbf16>
    tpu.vector_store %arg13[%c0_23, %c0_24], %28 {strides = array<i32>} : memref<128x416xbf16, #tpu.memory_space<vmem>>, vector<128x128xbf16>,
    %c0_25 = arith.constant 0 : index
    %c288 = arith.constant 288 : index
    %30 = vector.load %arg13[%c0_25, %c288] : memref<128x416xbf16, #tpu.memory_space<vmem>>, vector<128x128xbf16>
    tpu.vector_store %arg13[%c0_25, %c288], %28 {strides = array<i32>} : memref<128x416xbf16, #tpu.memory_space<vmem>>, vector<128x128xbf16>,
    %c0_26 = arith.constant 0 : index
    %c128 = arith.constant 128 : index
    %31 = vector.load %arg13[%c0_26, %c128] : memref<128x416xbf16, #tpu.memory_space<vmem>>, vector<128x160xbf16>
    tpu.vector_store %arg13[%c0_26, %c128], %27 {strides = array<i32>} : memref<128x416xbf16, #tpu.memory_space<vmem>>, vector<128x160xbf16>,
    %cst_27 = arith.constant 0.000000e+00 : bf16
    %32 = vector.broadcast %cst_27 : bf16 to vector<128x16xbf16>
    %c0_i32 = arith.constant 0 : i32
    %33 = arith.cmpi eq, %arg1, %c0_i32 : i32
    %34 = arith.extui %33 : i1 to i32
    %c0_i32_28 = arith.constant 0 : i32
    %35 = arith.cmpi ne, %34, %c0_i32_28 : i32
    scf.if %35 {
      %c0_76 = arith.constant 0 : index
      %c128_77 = arith.constant 128 : index
      %107 = vector.load %arg13[%c0_76, %c128_77] : memref<128x416xbf16, #tpu.memory_space<vmem>>, vector<128x16xbf16>
      tpu.vector_store %arg13[%c0_76, %c128_77], %32 {strides = array<i32>} : memref<128x416xbf16, #tpu.memory_space<vmem>>, vector<128x16xbf16>,
    } else {
    }
    %c1_i32 = arith.constant 1 : i32
    %36 = arith.cmpi eq, %arg1, %c1_i32 : i32
    %37 = arith.extui %36 : i1 to i32
    %c0_i32_29 = arith.constant 0 : i32
    %38 = arith.cmpi ne, %37, %c0_i32_29 : i32
    scf.if %38 {
      %c0_76 = arith.constant 0 : index
      %c272 = arith.constant 272 : index
      %107 = vector.load %arg13[%c0_76, %c272] : memref<128x416xbf16, #tpu.memory_space<vmem>>, vector<128x16xbf16>
      tpu.vector_store %arg13[%c0_76, %c272], %32 {strides = array<i32>} : memref<128x416xbf16, #tpu.memory_space<vmem>>, vector<128x16xbf16>,
    } else {
    }
    %c0_30 = arith.constant 0 : index
    %c0_31 = arith.constant 0 : index
    %39 = vector.load %arg10[%c0_30, %c0_31] : memref<2x128xbf16, #tpu.memory_space<vmem>>, vector<2x128xbf16>
    %40 = vector.extract_strided_slice %39 {offsets = [0, 0], sizes = [1, 128], strides = [1, 1]} : vector<2x128xbf16> to vector<1x128xbf16>
    %41 = vector.extract_strided_slice %39 {offsets = [1, 0], sizes = [1, 128], strides = [1, 1]} : vector<2x128xbf16> to vector<1x128xbf16>
    %cst_32 = arith.constant 0.000000e+00 : f32
    %42 = vector.broadcast %cst_32 : f32 to vector<8x128xf32>
    %c0_33 = arith.constant 0 : index
    %c127 = arith.constant 127 : index
    %43 = vector.load %arg13[%c0_33, %c127] : memref<128x416xbf16, #tpu.memory_space<vmem>>, vector<128x128xbf16>
    %44 = vector.broadcast %40 : vector<1x128xbf16> to vector<128x128xbf16>
    %45 = arith.mulf %43, %44 : vector<128x128xbf16>
    %c0_34 = arith.constant 0 : index
    %c0_35 = arith.constant 0 : index
    %c0_36 = arith.constant 0 : index
    %46 = vector.load %arg8[%c0_34, %c0_35, %c0_36] : memref<9x8x128xbf16, #tpu.memory_space<vmem>>, vector<1x8x128xbf16>
    %47 = vector.shape_cast %46 : vector<1x8x128xbf16> to vector<8x128xbf16>
    %cst_37 = arith.constant dense<0.000000e+00> : vector<8x128xf32>
    %48 = tpu.matmul %47, %45, %cst_37 {dimension_numbers = #tpu.dot_dimension_numbers<[1], [0], [0], [1], [0, 0, 1, 1], [], []>} : vector<8x128xbf16>, vector<128x128xbf16>, vector<8x128xf32> -> vector<8x128xf32>
    %49 = arith.addf %42, %48 : vector<8x128xf32>
    %c0_38 = arith.constant 0 : index
    %c128_39 = arith.constant 128 : index
    %50 = vector.load %arg13[%c0_38, %c128_39] : memref<128x416xbf16, #tpu.memory_space<vmem>>, vector<128x128xbf16>
    %c1 = arith.constant 1 : index
    %c0_40 = arith.constant 0 : index
    %c0_41 = arith.constant 0 : index
    %51 = vector.load %arg8[%c1, %c0_40, %c0_41] : memref<9x8x128xbf16, #tpu.memory_space<vmem>>, vector<1x8x128xbf16>
    %52 = vector.shape_cast %51 : vector<1x8x128xbf16> to vector<8x128xbf16>
    %cst_42 = arith.constant dense<0.000000e+00> : vector<8x128xf32>
    %53 = tpu.matmul %52, %50, %cst_42 {dimension_numbers = #tpu.dot_dimension_numbers<[1], [0], [0], [1], [0, 0, 1, 1], [], []>} : vector<8x128xbf16>, vector<128x128xbf16>, vector<8x128xf32> -> vector<8x128xf32>
    %54 = arith.addf %49, %53 : vector<8x128xf32>
    %c0_43 = arith.constant 0 : index
    %c129 = arith.constant 129 : index
    %55 = vector.load %arg13[%c0_43, %c129] : memref<128x416xbf16, #tpu.memory_space<vmem>>, vector<128x128xbf16>
    %56 = vector.broadcast %41 : vector<1x128xbf16> to vector<128x128xbf16>
    %57 = arith.mulf %55, %56 : vector<128x128xbf16>
    %c2 = arith.constant 2 : index
    %c0_44 = arith.constant 0 : index
    %c0_45 = arith.constant 0 : index
    %58 = vector.load %arg8[%c2, %c0_44, %c0_45] : memref<9x8x128xbf16, #tpu.memory_space<vmem>>, vector<1x8x128xbf16>
    %59 = vector.shape_cast %58 : vector<1x8x128xbf16> to vector<8x128xbf16>
    %cst_46 = arith.constant dense<0.000000e+00> : vector<8x128xf32>
    %60 = tpu.matmul %59, %57, %cst_46 {dimension_numbers = #tpu.dot_dimension_numbers<[1], [0], [0], [1], [0, 0, 1, 1], [], []>} : vector<8x128xbf16>, vector<128x128xbf16>, vector<8x128xf32> -> vector<8x128xf32>
    %61 = arith.addf %54, %60 : vector<8x128xf32>
    %c0_47 = arith.constant 0 : index
    %c143 = arith.constant 143 : index
    %62 = vector.load %arg13[%c0_47, %c143] : memref<128x416xbf16, #tpu.memory_space<vmem>>, vector<128x128xbf16>
    %63 = vector.broadcast %40 : vector<1x128xbf16> to vector<128x128xbf16>
    %64 = arith.mulf %62, %63 : vector<128x128xbf16>
    %c3 = arith.constant 3 : index
    %c0_48 = arith.constant 0 : index
    %c0_49 = arith.constant 0 : index
    %65 = vector.load %arg8[%c3, %c0_48, %c0_49] : memref<9x8x128xbf16, #tpu.memory_space<vmem>>, vector<1x8x128xbf16>
    %66 = vector.shape_cast %65 : vector<1x8x128xbf16> to vector<8x128xbf16>
    %cst_50 = arith.constant dense<0.000000e+00> : vector<8x128xf32>
    %67 = tpu.matmul %66, %64, %cst_50 {dimension_numbers = #tpu.dot_dimension_numbers<[1], [0], [0], [1], [0, 0, 1, 1], [], []>} : vector<8x128xbf16>, vector<128x128xbf16>, vector<8x128xf32> -> vector<8x128xf32>
    %68 = arith.addf %61, %67 : vector<8x128xf32>
    %c0_51 = arith.constant 0 : index
    %c144 = arith.constant 144 : index
    %69 = vector.load %arg13[%c0_51, %c144] : memref<128x416xbf16, #tpu.memory_space<vmem>>, vector<128x128xbf16>
    %c4 = arith.constant 4 : index
    %c0_52 = arith.constant 0 : index
    %c0_53 = arith.constant 0 : index
    %70 = vector.load %arg8[%c4, %c0_52, %c0_53] : memref<9x8x128xbf16, #tpu.memory_space<vmem>>, vector<1x8x128xbf16>
    %71 = vector.shape_cast %70 : vector<1x8x128xbf16> to vector<8x128xbf16>
    %cst_54 = arith.constant dense<0.000000e+00> : vector<8x128xf32>
    %72 = tpu.matmul %71, %69, %cst_54 {dimension_numbers = #tpu.dot_dimension_numbers<[1], [0], [0], [1], [0, 0, 1, 1], [], []>} : vector<8x128xbf16>, vector<128x128xbf16>, vector<8x128xf32> -> vector<8x128xf32>
    %73 = arith.addf %68, %72 : vector<8x128xf32>
    %c0_55 = arith.constant 0 : index
    %c145 = arith.constant 145 : index
    %74 = vector.load %arg13[%c0_55, %c145] : memref<128x416xbf16, #tpu.memory_space<vmem>>, vector<128x128xbf16>
    %75 = vector.broadcast %41 : vector<1x128xbf16> to vector<128x128xbf16>
    %76 = arith.mulf %74, %75 : vector<128x128xbf16>
    %c5 = arith.constant 5 : index
    %c0_56 = arith.constant 0 : index
    %c0_57 = arith.constant 0 : index
    %77 = vector.load %arg8[%c5, %c0_56, %c0_57] : memref<9x8x128xbf16, #tpu.memory_space<vmem>>, vector<1x8x128xbf16>
    %78 = vector.shape_cast %77 : vector<1x8x128xbf16> to vector<8x128xbf16>
    %cst_58 = arith.constant dense<0.000000e+00> : vector<8x128xf32>
    %79 = tpu.matmul %78, %76, %cst_58 {dimension_numbers = #tpu.dot_dimension_numbers<[1], [0], [0], [1], [0, 0, 1, 1], [], []>} : vector<8x128xbf16>, vector<128x128xbf16>, vector<8x128xf32> -> vector<8x128xf32>
    %80 = arith.addf %73, %79 : vector<8x128xf32>
    %c0_59 = arith.constant 0 : index
    %c159 = arith.constant 159 : index
    %81 = vector.load %arg13[%c0_59, %c159] : memref<128x416xbf16, #tpu.memory_space<vmem>>, vector<128x128xbf16>
    %82 = vector.broadcast %40 : vector<1x128xbf16> to vector<128x128xbf16>
    %83 = arith.mulf %81, %82 : vector<128x128xbf16>
    %c6 = arith.constant 6 : index
    %c0_60 = arith.constant 0 : index
    %c0_61 = arith.constant 0 : index
    %84 = vector.load %arg8[%c6, %c0_60, %c0_61] : memref<9x8x128xbf16, #tpu.memory_space<vmem>>, vector<1x8x128xbf16>
    %85 = vector.shape_cast %84 : vector<1x8x128xbf16> to vector<8x128xbf16>
    %cst_62 = arith.constant dense<0.000000e+00> : vector<8x128xf32>
    %86 = tpu.matmul %85, %83, %cst_62 {dimension_numbers = #tpu.dot_dimension_numbers<[1], [0], [0], [1], [0, 0, 1, 1], [], []>} : vector<8x128xbf16>, vector<128x128xbf16>, vector<8x128xf32> -> vector<8x128xf32>
    %87 = arith.addf %80, %86 : vector<8x128xf32>
    %c0_63 = arith.constant 0 : index
    %c160 = arith.constant 160 : index
    %88 = vector.load %arg13[%c0_63, %c160] : memref<128x416xbf16, #tpu.memory_space<vmem>>, vector<128x128xbf16>
    %c7 = arith.constant 7 : index
    %c0_64 = arith.constant 0 : index
    %c0_65 = arith.constant 0 : index
    %89 = vector.load %arg8[%c7, %c0_64, %c0_65] : memref<9x8x128xbf16, #tpu.memory_space<vmem>>, vector<1x8x128xbf16>
    %90 = vector.shape_cast %89 : vector<1x8x128xbf16> to vector<8x128xbf16>
    %cst_66 = arith.constant dense<0.000000e+00> : vector<8x128xf32>
    %91 = tpu.matmul %90, %88, %cst_66 {dimension_numbers = #tpu.dot_dimension_numbers<[1], [0], [0], [1], [0, 0, 1, 1], [], []>} : vector<8x128xbf16>, vector<128x128xbf16>, vector<8x128xf32> -> vector<8x128xf32>
    %92 = arith.addf %87, %91 : vector<8x128xf32>
    %c0_67 = arith.constant 0 : index
    %c161 = arith.constant 161 : index
    %93 = vector.load %arg13[%c0_67, %c161] : memref<128x416xbf16, #tpu.memory_space<vmem>>, vector<128x128xbf16>
    %94 = vector.broadcast %41 : vector<1x128xbf16> to vector<128x128xbf16>
    %95 = arith.mulf %93, %94 : vector<128x128xbf16>
    %c8 = arith.constant 8 : index
    %c0_68 = arith.constant 0 : index
    %c0_69 = arith.constant 0 : index
    %96 = vector.load %arg8[%c8, %c0_68, %c0_69] : memref<9x8x128xbf16, #tpu.memory_space<vmem>>, vector<1x8x128xbf16>
    %97 = vector.shape_cast %96 : vector<1x8x128xbf16> to vector<8x128xbf16>
    %cst_70 = arith.constant dense<0.000000e+00> : vector<8x128xf32>
    %98 = tpu.matmul %97, %95, %cst_70 {dimension_numbers = #tpu.dot_dimension_numbers<[1], [0], [0], [1], [0, 0, 1, 1], [], []>} : vector<8x128xbf16>, vector<128x128xbf16>, vector<8x128xf32> -> vector<8x128xf32>
    %99 = arith.addf %92, %98 : vector<8x128xf32>
    %c0_71 = arith.constant 0 : index
    %c0_72 = arith.constant 0 : index
    %100 = vector.load %arg9[%c0_71, %c0_72] : memref<8x1xf32, #tpu.memory_space<vmem>>, vector<8x1xf32>
    %101 = vector.broadcast %100 : vector<8x1xf32> to vector<8x128xf32>
    %102 = arith.addf %99, %101 : vector<8x128xf32>
    %103 = arith.truncf %102 : vector<8x128xf32> to vector<8x128xbf16>
    %c0_73 = arith.constant 0 : index
    %c0_74 = arith.constant 0 : index
    %c0_75 = arith.constant 0 : index
    %104 = vector.load %arg11[%c0_73, %c0_74, %c0_75] : memref<1x8x128xbf16, #tpu.memory_space<vmem>>, vector<1x8x128xbf16>
    %105 = vector.shape_cast %104 : vector<1x8x128xbf16> to vector<8x128xbf16>
    %106 = vector.shape_cast %103 : vector<8x128xbf16> to vector<1x8x128xbf16>
    tpu.vector_store %arg11[%c0_73, %c0_74, %c0_75], %106 {strides = array<i32>} : memref<1x8x128xbf16, #tpu.memory_space<vmem>>, vector<1x8x128xbf16>,
    return
  }
  func.func @transform_0(%arg0: i32, %arg1: i32) -> (i32, i32, i32, i32) {
    %c0_i32 = arith.constant 0 : i32
    %c0_i32_0 = arith.constant 0 : i32
    %c0_i32_1 = arith.constant 0 : i32
    return %arg0, %arg1, %c0_i32, %c0_i32_0 : i32, i32, i32, i32
  }
  func.func @transform_1(%arg0: i32, %arg1: i32) -> (i32, i32, i32) {
    %c0_i32 = arith.constant 0 : i32
    %c0_i32_0 = arith.constant 0 : i32
    return %arg0, %c0_i32, %arg1 : i32, i32, i32
  }
  func.func @transform_2(%arg0: i32, %arg1: i32) -> (i32, i32, i32) {
    %c0_i32 = arith.constant 0 : i32
    %c0_i32_0 = arith.constant 0 : i32
    return %arg0, %c0_i32, %arg1 : i32, i32, i32
  }
  func.func @transform_3(%arg0: i32, %arg1: i32) -> (i32, i32) {
    %c0_i32 = arith.constant 0 : i32
    %c0_i32_0 = arith.constant 0 : i32
    %c0_i32_1 = arith.constant 0 : i32
    return %c0_i32, %c0_i32_0 : i32, i32
  }
  func.func @transform_4(%arg0: i32, %arg1: i32) -> (i32, i32) {
    %c0_i32 = arith.constant 0 : i32
    %c0_i32_0 = arith.constant 0 : i32
    %c0_i32_1 = arith.constant 0 : i32
    return %c0_i32, %c0_i32_0 : i32, i32
  }
  func.func @transform_5(%arg0: i32, %arg1: i32) -> (i32, i32) {
    %c0_i32 = arith.constant 0 : i32
    %c0_i32_0 = arith.constant 0 : i32
    %c0_i32_1 = arith.constant 0 : i32
    return %c0_i32, %c0_i32_0 : i32, i32
  }
  func.func @transform_6(%arg0: i32, %arg1: i32) -> (i32, i32, i32) {
    %c0_i32 = arith.constant 0 : i32
    %c0_i32_0 = arith.constant 0 : i32
    %c0_i32_1 = arith.constant 0 : i32
    %c0_i32_2 = arith.constant 0 : i32
    return %c0_i32, %c0_i32_0, %c0_i32_1 : i32, i32, i32
  }
  func.func @transform_7(%arg0: i32, %arg1: i32) -> (i32, i32) {
    %c0_i32 = arith.constant 0 : i32
    %c0_i32_0 = arith.constant 0 : i32
    %c0_i32_1 = arith.constant 0 : i32
    return %c0_i32, %c0_i32_0 : i32, i32
  }
  func.func @transform_8(%arg0: i32, %arg1: i32) -> (i32, i32) {
    %c0_i32 = arith.constant 0 : i32
    %c0_i32_0 = arith.constant 0 : i32
    %c0_i32_1 = arith.constant 0 : i32
    return %c0_i32, %c0_i32_0 : i32, i32
  }
  func.func @transform_9(%arg0: i32, %arg1: i32) -> (i32, i32, i32) {
    %c0_i32 = arith.constant 0 : i32
    %c0_i32_0 = arith.constant 0 : i32
    return %arg0, %c0_i32, %arg1 : i32, i32, i32
  }
  func.func @transform_10(%arg0: i32, %arg1: i32) -> (i32, i32, i32, i32) {
    %c0_i32 = arith.constant 0 : i32
    %c0_i32_0 = arith.constant 0 : i32
    %c0_i32_1 = arith.constant 0 : i32
    return %arg0, %arg1, %c0_i32, %c0_i32_0 : i32, i32, i32, i32
  }
}

</mosaic_0001>

<bundles_post_ra>
// kernel: tpu_custom_call.1
= control target key start
LH: loop header
LB: loop body
LE: loop exit
PB: predicated region body
PF: predicated region fallthrough
CT: control target
= control target key end

     0   :  { %s3638_s0 = inlined_call_operand.vmem [shape: bf16[2,2,32,160], index: 0, kind: input, shape index: {}]   ;;  %s3639_s1 = inlined_call_operand.vmem [shape: f32[2,4,256], index: 1, kind: input, shape index: {}]   ;;  %s3640_s2 = inlined_call_operand.vmem [shape: f32[2,1,256], index: 2, kind: input, shape index: {}]   ;;  %s3641_s3 = inlined_call_operand.vmem [shape: f32[4,1], index: 3, kind: input, shape index: {}]   ;;  %s3642_s4 = inlined_call_operand.vmem [shape: bf16[128,32], index: 4, kind: input, shape index: {}]   ;;  %s3643_s5 = inlined_call_operand.vmem [shape: f32[128,1], index: 5, kind: input, shape index: {}]   ;;  %s3644_s6 = inlined_call_operand.vmem [shape: bf16[9,8,128], index: 6, kind: input, shape index: {}]   ;;  %s3645_s7 = inlined_call_operand.vmem [shape: f32[8,1], index: 7, kind: input, shape index: {}]   ;;  %s3646_s8 = inlined_call_operand.vmem [shape: bf16[2,128], index: 8, kind: input, shape index: {}]   ;;  %s3647_s9 = inlined_call_operand.hbm [shape: bf16[2,8,256], index: 9, kind: output, shape index: {0}]   ;;  %s3648_s10 = inlined_call_operand.vmem [shape: f32[2,2,4,2], index: 10, kind: output, shape index: {1}]  }
   0x1   :  { %3660 = sst [smem:[#allocation15_spill]] %s3641_s3 }
   0x2   :  { %3661 = sst [smem:[#allocation16_spill]] %s3647_s9 }
   0x3   :  { %16 = vsyncpa [#allocation4], 0 }
   0x4   :  { %18 = vsyncpa [#allocation4 + $0x1], 0  ;;  %s2746_s13 = smov 0   ;;  %s2748_s14 = smov 0  }
   0x5   :  { %s2750_s15 = smov 0   ;;  %s2752_s16 = smov 0  }
   0x6   :  { %s2754_s17 = smov 0   ;;  %s2756_s18 = smov 0  }
   0x7   :  { %s2758_s19 = smov 0   ;;  %s2760_s20 = smov 0  }
   0x8 LB: > { %3662 = sst [smem:[#allocation6_spill]] %s2643_s13  ;;  %s2161_s21 = sadd.s32 4294967295, %s2671_s20   ;;  %s2671_s20 = sphi %s2760_s20, %s24_s20   ;;  %s2667_s19 = sphi %s2758_s19, %s3685_s19   ;;  %s2663_s18 = sphi %s2756_s18, %s3684_s18   ;;  %s2659_s17 = sphi %s2754_s17, %s3683_s17   ;;  %s2655_s16 = sphi %s2752_s16, %s3688_s16   ;;  %s2651_s15 = sphi %s2750_s15, %s3681_s15   ;;  %s2647_s14 = sphi %s2748_s14, %s3687_s14   ;;  %s2643_s13 = sphi %s2746_s13, %s3686_s13  }
   0x9   : > { %3663 = sst [smem:[#allocation7_spill]] %s2651_s15  ;;  %s2162_s22 = sadd.s32 4294967294, %s2671_s20  }
   0xa   : > { %3664 = sst [smem:[#allocation8_spill]] %s2663_s18  ;;  %s33_s23 = sadd.s32 1, %s2663_s18 }
   0xb   : > { %3665 = sst [smem:[#allocation9_spill]] %s2667_s19  ;;  %p34_p0 = scmp.ge.s32.totalorder %s33_s23, 2 }
   0xc   : > { %3666 = sst [smem:[#allocation10_spill]] %s2671_s20  ;;  %s36_s24 = sadd.s32 1, %s2667_s19 }
   0xd   : > { %p265_p1 = scmp.ne.s32.totalorder %s2651_s15, %s2647_s14  ;;  %p266_p2 = scmp.eq.s32.totalorder %s2161_s21, 3 }
   0xe   : > { %s3690_s23 = smov (%p34_p0, %s33_s23), 0  ;;  %s3692_s24 = smov (!%p34_p0, %s36_s24), %s2667_s19 }
   0xf   : > { %3667 = sst [smem:[#allocation11_spill]] %s3690_s23  ;;  %s251_s25 = ssub.s32 %s2663_s18, %s3690_s23 }
  0x10   : > { %p2797_p3 = por %p266_p2, %p265_p1  ;;  %p38_p4 = scmp.ge.s32.totalorder %s3692_s24, 2 }
  0x11   : > { %p271_p5 = scmp.ne.s32.totalorder %s2647_s14, %s2643_s13  ;;  %p272_p6 = scmp.eq.s32.totalorder %s2162_s22, 3 }
  0x12   : > { %p2165_p7 = scmp.ge.s32.totalorder %s2671_s20, 1  ;;  %s3694_s24 = smov (%p38_p4, %s3692_s24), 0 }
  0x13   : > { %3669 = sst [smem:[#allocation12_spill]] %s3694_s24  ;;  %p2806_p8 = por %p272_p6, %p271_p5 }
  0x14   : > { %p369_p9 = scmp.lt.s32.totalorder %s2671_s20, 5  ;;  %s250_s28 = ssub.s32 %s2667_s19, %s3694_s24 }
  0x15   : > { %s3670_s27 = scalar_select %p2806_p8, 1, 0 }
  0x16   : > { %s255_s29 = sadd.s32 1, %s2651_s15  ;;  %s252_s30 = sor.u32 %s251_s25, %s250_s28 }
  0x17   : > { %3671 = sst [smem:[#allocation13_spill]] %s3670_s27  ;;  %p370_p10 = pnand %p2165_p7, %p369_p9 }
  0x18   : > { %p253_p11 = scmp.eq.s32.totalorder %s252_s30, 0  ;;  %s3673_s3 = sld [smem:[#allocation15_spill]] (!%p370_p10)  ;;  %v2673_v1 = vmov (!%p370_p10), 0   ;;  %v520_v2 = vld [vmem:[%s3643_s5 + $0x28] sm:$0xff] (!%p370_p10)  ;;  %vm671_vm0 = vcmask (!%p370_p10), 261120   ;;  %v515_v3 = vld [vmem:[%s3643_s5] sm:$0xff] (!%p370_p10) }
  0x19   : > { %373 = sbr.rel (%p370_p10) target bundleno = 1040 (0x410), region = 56  ;;  %s3649_s22 = sand.u32 (!%p370_p10), 1, %s2647_s14   ;;  %2560 = vset.pattern.permute.xlu0 (!%p370_p10), %v2673_v1  ;;  %857 = vst [vmem:[#allocation2] sm:$0xff] (!%p370_p10), %v2673_v1  ;;  %858 = vst [vmem:[#allocation2 + $0x20] sm:$0xff] (!%p370_p10), %v2673_v1  ;;  %728 = vmatprep.mubr.bf16.mxu0 (!%p370_p10), %v2673_v1  ;;  %v516_v4 = vld [vmem:[%s3643_s5 + $0x8] sm:$0xff] (!%p370_p10)  ;;  %v526_v5 = vld [vmem:[%s3643_s5 + $0x58] sm:$0xff] (!%p370_p10) }
  0x1a   : > { %s2815_s11 = scalar_select %p253_p11, %s2651_s15, %s255_s29  }
  0x1b   : > { %859 = vst [vmem:[#allocation2 + $0x40] sm:$0xff] (!%p370_p10), %v2673_v1  ;;  %860 = vst [vmem:[#allocation2 + $0x60] sm:$0xff] (!%p370_p10), %v2673_v1  ;;  %s2832_s25 = sshll.u32 (!%p370_p10), %s3649_s22, 2  ;;  %p434_p12 = scmp.lt.s32.totalorder (!%p370_p10), %s2659_s17, 1  ;;  %2561 = vset.pattern.permute.xlu1 (!%p370_p10), %v2673_v1  ;;  %v528_v6 = vld [vmem:[%s3643_s5 + $0x68] sm:$0xff] (!%p370_p10)  ;;  %v517_v7 = vld [vmem:[%s3643_s5 + $0x10] sm:$0xff] (!%p370_p10) }
  0x1c   : > { %3672 = sst [smem:[#allocation14_spill]] %s2815_s11  ;;  %861 = vst [vmem:[#allocation2 + $0x80] sm:$0xff] (!%p370_p10), %v2673_v1  ;;  %862 = vst [vmem:[#allocation2 + $0xa0] sm:$0xff] (!%p370_p10), %v2673_v1  ;;  %p436_p13 = scmp.lt.s32.totalorder (!%p370_p10), %s2655_s16, 1  ;;  %533 = vperm.xlu1 (!%p370_p10), %2561, %v515_v3   ;;  %v518_v12 = vld [vmem:[%s3643_s5 + $0x18] sm:$0xff] (!%p370_p10)  ;;  %v2568_v13 = vld [vmem:[%s3642_s4] sm:$0xff] (!%p370_p10)  }
  0x1d   : > { %863 = vst [vmem:[#allocation2 + $0xc0] sm:$0xff] (!%p370_p10), %v2673_v1  ;;  %864 = vst [vmem:[#allocation2 + $0xe0] sm:$0xff] (!%p370_p10), %v2673_v1  ;;  %v519_v14 = vld [vmem:[%s3643_s5 + $0x20] sm:$0xff] (!%p370_p10)  ;;  %v521_v15 = vld [vmem:[%s3643_s5 + $0x30] sm:$0xff] (!%p370_p10)  ;;  %vm865_vm1 = vcmask (!%p370_p10), 1047808   ;;  %vm483_vm2 = vcmask (!%p370_p10), 1043456  }
  0x1e   : > { %v469_v0 = vld [vmem:[%s3673_s3] sm:$0xf] (!%p370_p10)  ;;  %v2569_v16 = vld [vmem:[%s3642_s4 + $0x8] sm:$0xff] (!%p370_p10)   ;;  %v522_v17 = vld [vmem:[%s3643_s5 + $0x38] sm:$0xff] (!%p370_p10)  ;;  %866 = vst.msk [vmem:[#allocation2 + $0x10] sm:$0xff] (!%p370_p10), %vm865_vm1, %v2673_v1  ;;  %vm491_vm3 = vcmask (!%p370_p10), 7168  }
  0x1f   : > { %478 = vperm.xlu0 (!%p370_p10), %2560, %v469_v0   ;;  %v523_v18 = vld [vmem:[%s3643_s5 + $0x40] sm:$0xff] (!%p370_p10)  ;;  %v2570_v19 = vld [vmem:[%s3642_s4 + $0x10] sm:$0xff] (!%p370_p10)   ;;  %v524_v20 = vld [vmem:[%s3643_s5 + $0x48] sm:$0xff] (!%p370_p10)  ;;  %868 = vst.msk [vmem:[#allocation2 + $0x30] sm:$0xff] (!%p370_p10), %vm865_vm1, %v2673_v1  ;;  %vm493_vm4 = vcmask (!%p370_p10), 11264   ;;  %p2196_p0 = scmp.ne.s32.totalorder (!%p370_p10), %s2655_s16, 0 }
  0x20   : > { %s435_s30 = scalar_select %p434_p12, %s2659_s17, 1  ;;  %538 = vperm.xlu1 %2561, %v516_v4   ;;  %v525_v21 = vld [vmem:[%s3643_s5 + $0x50] sm:$0xff]  ;;  %v2571_v22 = vld [vmem:[%s3642_s4 + $0x18] sm:$0xff]   ;;  %v527_v23 = vld [vmem:[%s3643_s5 + $0x60] sm:$0xff]  ;;  %870 = vst.msk [vmem:[#allocation2 + $0x50] sm:$0xff] %vm865_vm1, %v2673_v1 }
  0x21   : > { %s437_s3 = scalar_select %p436_p13, %s2655_s16, 1  ;;  %v2572_v24 = vld [vmem:[%s3642_s4 + $0x20] sm:$0xff]   ;;  %v2573_v25 = vld [vmem:[%s3642_s4 + $0x28] sm:$0xff]   ;;  %v2574_v26 = vld [vmem:[%s3642_s4 + $0x30] sm:$0xff]   ;;  %872 = vst.msk [vmem:[#allocation2 + $0x70] sm:$0xff] %vm865_vm1, %v2673_v1 }
  0x22   : > { %s2168_s22 = sshll.u32 %s435_s30, 4  ;;  %s2170_s19 = sshll.u32 %s435_s30, 1  ;;  %v2575_v27 = vld [vmem:[%s3642_s4 + $0x38] sm:$0xff]   ;;  %874 = vst.msk [vmem:[#allocation2 + $0x90] sm:$0xff] %vm865_vm1, %v2673_v1  ;;  %876 = vst.msk [vmem:[#allocation2 + $0xb0] sm:$0xff] %vm865_vm1, %v2673_v1  ;;  %v529_v36 = vld [vmem:[%s3643_s5 + $0x70] sm:$0xff] }
  0x23   : > { %558 = vperm.xlu0 %2560, %v520_v2   ;;  %s2167_s28 = sshll.u32 %s437_s3, 3  ;;  %s2849_s29 = sadd.s32 %s2170_s19, %s437_s3  ;;  %878 = vst.msk [vmem:[#allocation2 + $0xd0] sm:$0xff] %vm865_vm1, %v2673_v1  ;;  %880 = vst.msk [vmem:[#allocation2 + $0xf0] sm:$0xff] %vm865_vm1, %v2673_v1  ;;  %v530_v37 = vld [vmem:[%s3643_s5 + $0x78] sm:$0xff]  ;;  %vm902_vm5 = vcmask (!%p2196_p0), 130048  }
  0x24   : > { %s440_s15 = sadd.s32 %s2168_s22, %s2167_s28  ;;  %543 = vperm.xlu1 %2561, %v517_v7   ;;  %s2171_s3 = sshll.u32 %s2849_s29, 2 }
  0x25   : > { %s2169_s27 = sshll.u32 %s440_s15, 2  ;;  %s457_s18 = scalar_lea.vmem %s3640_s2, %s2849_s29 }
  0x26   : > { %s442_s13 = scalar_lea.vmem %s3638_s0, %s2169_s27  ;;  %v2175_v28 = vld [vmem:[%s457_s18] ss:$0 sm:$0xff]  ;;  %s465_s21 = scalar_lea.vmem %s3648_s10, %s2171_s3 }
  0x27   : > { %588 = vperm.xlu0 %2560, %v526_v5   ;;  %v2562_v8 = vld [vmem:[%s442_s13 + $0x4] ss:$8 sps:$4 sm:$0xff]   ;;  %v2564_v9 = vld [vmem:[%s442_s13] ss:$8 sps:$4 sm:$0xff]   ;;  %v2565_v10 = vld [vmem:[%s442_s13 + $0x14] ss:$8 sps:$4 sm:$0xff]  }
  0x28   : > { %696 = vmatprep.subr.bf16.mxu0 %v2562_v8  ;;  %v2567_v11 = vld [vmem:[%s442_s13 + $0x10] ss:$8 sps:$4 sm:$0xff]   ;;  %548 = vperm.xlu1 %2561, %v518_v12   ;;  %s450_s13 = scalar_lea.vmem %s3639_s1, %s2171_s3  ;;  %s423_s29 = scalar_lea.vmem [#allocation3], %s2832_s25 }
  0x29   : > { %697 = vmatpush1.bf16.msra.mxu0 %v2564_v9  ;;  %v467_v30 = vld [vmem:[%s450_s13] sm:$0xf] }
  0x2a   : > { %698 = vmatprep.subr.bf16.mxu0 %v2565_v10 }
  0x2b   : > { %598 = vperm.xlu0 %2560, %v528_v6  }
  0x2c   : > { %553 = vperm.xlu1 %2561, %v519_v14  }
  0x2d   : > { %699 = vmatpush1.bf16.msra.mxu0 %v2567_v11 }
  0x30   : > { %2188 = vmatmul.mubr.msk.bf16.vlgmr.msra.gmra.mrb[0].mxu0 %vm671_vm0, %v2568_v13  ;;  %563 = vperm.xlu1 %2561, %v521_v15  }
  0x31   : > { %738 = vmatprep.mubr.bf16.mxu0 %v2673_v1 }
  0x34   : > { %568 = vperm.xlu1 %2561, %v522_v17  }
  0x38   : > { %2189 = vmatmul.mubr.msk.bf16.gmra.mrb[4].mxu0 %vm671_vm0, %v2569_v16  ;;  %573 = vperm.xlu1 %2561, %v523_v18  }
  0x39   : > { %748 = vmatprep.mubr.bf16.mxu0 %v2673_v1 }
  0x3c   : > { %578 = vperm.xlu1 %2561, %v524_v20  }
  0x40   : > { %2190 = vmatmul.mubr.msk.bf16.gmra.mrb[8].mxu0 %vm671_vm0, %v2570_v19  ;;  %583 = vperm.xlu1 %2561, %v525_v21  }
  0x41   : > { %758 = vmatprep.mubr.bf16.mxu0 %v2673_v1 }
  0x44   : > { %593 = vperm.xlu1 %2561, %v527_v23  }
  0x48   : > { %2191 = vmatmul.mubr.msk.bf16.gmra.mrb[12].mxu0 %vm671_vm0, %v2571_v22 }
  0x49   : > { %768 = vmatprep.mubr.bf16.mxu0 %v2673_v1 }
  0x50   : > { %2192 = vmatmul.mubr.msk.bf16.gmra.mrb[16].mxu0 %vm671_vm0, %v2572_v24 }
  0x51   : > { %778 = vmatprep.mubr.bf16.mxu0 %v2673_v1 }
  0x58   : > { %2193 = vmatmul.mubr.msk.bf16.gmra.mrb[20].mxu0 %vm671_vm0, %v2573_v25 }
  0x59   : > { %788 = vmatprep.mubr.bf16.mxu0 %v2673_v1 }
  0x60   : > { %2194 = vmatmul.mubr.msk.bf16.gmra.mrb[24].mxu0 %vm671_vm0, %v2574_v26 }
  0x61   : > { %798 = vmatprep.mubr.bf16.mxu0 %v2673_v1 }
  0x68   : > { %2195 = vmatmul.mubr.msk.bf16.gmra.mrb[28].mxu0 %vm671_vm0, %v2575_v27 }
  0x9b   : > { %v534_v38 = vpop.permute.xlu1 %533 }
  0x9e   : > { %v479_v29 = vpop.permute.xlu0 %478 }
  0x9f   : > { %v481_v31 = vmul.f32 %v2175_v28, %v479_v29  ;;  %v539_v39 = vpop.permute.xlu1 %538 }
  0xa1   : > { %v482_v32 = vadd.f32 %v481_v31, %v467_v30 }
  0xa2   : > { %v559_v12 = vpop.permute.xlu0 %558 }
  0xa3   : > { %v484_v33 = vsel %vm483_vm2, %v482_v32, 0.0  ;;  %v487_v34 = vmul.f32 %v482_v32, %v482_v32  ;;  %v544_v40 = vpop.permute.xlu1 %543 }
  0xa4   : > { %485 = vadd.xlane.f32.xlu0 %v484_v33 }
  0xa5   : > { %v488_v35 = vsel %vm483_vm2, %v487_v34, 0.0 }
  0xa6   : > { %489 = vadd.xlane.f32.xlu1 %v488_v35 }
  0xa7   : > { %v549_v42 = vpop.permute.xlu1 %548 }
  0xab   : > { %v554_v54 = vpop.permute.xlu1 %553 }
  0xaf   : > { %v564_v2 = vpop.permute.xlu1 %563 }
  0xb3   : > { %v569_v15 = vpop.permute.xlu1 %568 }
  0xb7   : > { %603 = vperm.xlu1 %2561, %v529_v36   ;;  %v574_v26 = vpop.permute.xlu1 %573 }
  0xba   : > { %608 = vperm.xlu0 %2560, %v530_v37  }
 0x103   : > { %v730_v41 = vpop.f32.mrb[0].mxu0 }
 0x104   : > { %v731_v43 = vadd.f32 %v730_v41, %v534_v38  ;;  %v732_v44 = vpop.f32.mrb[1].mxu0 }
 0x105   : > { %v733_v45 = vadd.f32 %v732_v44, %v534_v38  ;;  %v734_v46 = vpop.f32.mrb[2].mxu0  ;;  %v579_v38 = vpop.permute.xlu1 %578 }
 0x106   : > { %v735_v47 = vadd.f32 %v734_v46, %v539_v39  ;;  %v736_v48 = vpop.f32.mrb[3].mxu0  ;;  %v809_v50 = vmax.f32 %v731_v43, 0.0  ;;  %v589_v46 = vpop.permute.xlu0 %588 }
 0x107   : > { %v737_v49 = vadd.f32 %v736_v48, %v539_v39  ;;  %v810_v52 = vmax.f32 %v733_v45, 0.0 }
 0x108   : > { %v811_v51 = vmax.f32 %v735_v47, 0.0 }
 0x109   : > { %v812_v53 = vmax.f32 %v737_v49, 0.0 }
 0x10a   : > { %v841_v55 = vpack.c.bf16 %v811_v51, %v809_v50  ;;  %v584_v50 = vpop.permute.xlu1 %583 }
 0x10b   : > { %v842_v56 = vpack.c.bf16 %v812_v53, %v810_v52  ;;  %v740_v57 = vpop.f32.mrb[4].mxu0 }
 0x10c   : > { %882 = vst [vmem:[#allocation2 + $0x8] sm:$0xff] %v841_v55  ;;  %v741_v58 = vadd.f32 %v740_v57, %v544_v40  ;;  %v742_v59 = vpop.f32.mrb[5].mxu0 }
 0x10d   : > { %883 = vst.msk [vmem:[#allocation2 + $0x10] sm:$0xff] %vm671_vm0, %v842_v56  ;;  %v743_v60 = vadd.f32 %v742_v59, %v544_v40  ;;  %v744_v61 = vpop.f32.mrb[6].mxu0 }
 0x10e   : > { %v745_v62 = vadd.f32 %v744_v61, %v549_v42  ;;  %v746_v63 = vpop.f32.mrb[7].mxu0  ;;  %v813_v3 = vmax.f32 %v741_v58, 0.0  ;;  %v599_v58 = vpop.permute.xlu0 %598 }
 0x10f   : > { %v747_v0 = vadd.f32 %v746_v63, %v549_v42  ;;  %v814_v5 = vmax.f32 %v743_v60, 0.0  ;;  %v594_v63 = vpop.permute.xlu1 %593 }
 0x110   : > { %v815_v4 = vmax.f32 %v745_v62, 0.0 }
 0x111   : > { %v816_v6 = vmax.f32 %v747_v0, 0.0 }
 0x112   : > { %v843_v7 = vpack.c.bf16 %v815_v4, %v813_v3 }
 0x113   : > { %v844_v8 = vpack.c.bf16 %v816_v6, %v814_v5  ;;  %v750_v9 = vpop.f32.mrb[8].mxu0 }
 0x114   : > { %884 = vst [vmem:[#allocation2 + $0x28] sm:$0xff] %v843_v7  ;;  %v751_v10 = vadd.f32 %v750_v9, %v554_v54  ;;  %v752_v11 = vpop.f32.mrb[9].mxu0 }
 0x115   : > { %885 = vst.msk [vmem:[#allocation2 + $0x30] sm:$0xff] %vm671_vm0, %v844_v8  ;;  %v753_v13 = vadd.f32 %v752_v11, %v554_v54  ;;  %v754_v14 = vpop.f32.mrb[10].mxu0 }
 0x116   : > { %v755_v16 = vadd.f32 %v754_v14, %v559_v12  ;;  %v756_v17 = vpop.f32.mrb[11].mxu0  ;;  %v817_v19 = vmax.f32 %v751_v10, 0.0 }
 0x117   : > { %v757_v18 = vadd.f32 %v756_v17, %v559_v12  ;;  %v818_v21 = vmax.f32 %v753_v13, 0.0 }
 0x118   : > { %v819_v20 = vmax.f32 %v755_v16, 0.0 }
 0x119   : > { %v820_v22 = vmax.f32 %v757_v18, 0.0 }
 0x11a   : > { %v845_v23 = vpack.c.bf16 %v819_v20, %v817_v19 }
 0x11b   : > { %v846_v24 = vpack.c.bf16 %v820_v22, %v818_v21  ;;  %v760_v25 = vpop.f32.mrb[12].mxu0 }
 0x11c   : > { %886 = vst [vmem:[#allocation2 + $0x48] sm:$0xff] %v845_v23  ;;  %v761_v27 = vadd.f32 %v760_v25, %v564_v2  ;;  %v762_v28 = vpop.f32.mrb[13].mxu0 }
 0x11d   : > { %887 = vst.msk [vmem:[#allocation2 + $0x50] sm:$0xff] %vm671_vm0, %v846_v24  ;;  %v763_v29 = vadd.f32 %v762_v28, %v564_v2  ;;  %v764_v30 = vpop.f32.mrb[14].mxu0 }
 0x11e   : > { %v765_v31 = vadd.f32 %v764_v30, %v569_v15  ;;  %v766_v32 = vpop.f32.mrb[15].mxu0  ;;  %v821_v34 = vmax.f32 %v761_v27, 0.0 }
 0x11f   : > { %v767_v33 = vadd.f32 %v766_v32, %v569_v15  ;;  %v822_v36 = vmax.f32 %v763_v29, 0.0 }
 0x120   : > { %v823_v35 = vmax.f32 %v765_v31, 0.0 }
 0x121   : > { %v824_v37 = vmax.f32 %v767_v33, 0.0 }
 0x122   : > { %v847_v39 = vpack.c.bf16 %v823_v35, %v821_v34 }
 0x123   : > { %v848_v40 = vpack.c.bf16 %v824_v37, %v822_v36  ;;  %v770_v41 = vpop.f32.mrb[16].mxu0 }
 0x124   : > { %888 = vst [vmem:[#allocation2 + $0x68] sm:$0xff] %v847_v39  ;;  %v771_v42 = vadd.f32 %v770_v41, %v574_v26  ;;  %v772_v43 = vpop.f32.mrb[17].mxu0 }
 0x125   : > { %889 = vst.msk [vmem:[#allocation2 + $0x70] sm:$0xff] %vm671_vm0, %v848_v40  ;;  %v773_v44 = vadd.f32 %v772_v43, %v574_v26  ;;  %v774_v45 = vpop.f32.mrb[18].mxu0  ;;  %v2674_v43 = vmov (!%p2196_p0), 0  }
 0x126   : > { %v775_v47 = vadd.f32 %v774_v45, %v579_v38  ;;  %v776_v48 = vpop.f32.mrb[19].mxu0  ;;  %v825_v51 = vmax.f32 %v771_v42, 0.0  ;;  %903 = vst.msk [vmem:[#allocation2 + $0x8] sm:$0xff] (!%p2196_p0), %vm902_vm5, %v2674_v43  ;;  %904 = vst.msk [vmem:[#allocation2 + $0x28] sm:$0xff] (!%p2196_p0), %vm902_vm5, %v2674_v43 }
 0x127   : > { %v777_v49 = vadd.f32 %v776_v48, %v579_v38  ;;  %v826_v53 = vmax.f32 %v773_v44, 0.0  ;;  %905 = vst.msk [vmem:[#allocation2 + $0x48] sm:$0xff] (!%p2196_p0), %vm902_vm5, %v2674_v43  ;;  %906 = vst.msk [vmem:[#allocation2 + $0x68] sm:$0xff] (!%p2196_p0), %vm902_vm5, %v2674_v43 }
 0x128   : > { %v827_v52 = vmax.f32 %v775_v47, 0.0 }
 0x129   : > { %v828_v54 = vmax.f32 %v777_v49, 0.0 }
 0x12a   : > { %v849_v55 = vpack.c.bf16 %v827_v52, %v825_v51 }
 0x12b   : > { %v850_v56 = vpack.c.bf16 %v828_v54, %v826_v53  ;;  %v780_v57 = vpop.f32.mrb[20].mxu0 }
 0x12c   : > { %890 = vst [vmem:[#allocation2 + $0x88] sm:$0xff] %v849_v55  ;;  %v781_v59 = vadd.f32 %v780_v57, %v584_v50  ;;  %v782_v60 = vpop.f32.mrb[21].mxu0 }
 0x12d   : > { %891 = vst.msk [vmem:[#allocation2 + $0x90] sm:$0xff] %vm671_vm0, %v850_v56  ;;  %v783_v61 = vadd.f32 %v782_v60, %v584_v50  ;;  %v784_v62 = vpop.f32.mrb[22].mxu0 }
 0x12e   : > { %v785_v0 = vadd.f32 %v784_v62, %v589_v46  ;;  %v786_v2 = vpop.f32.mrb[23].mxu0  ;;  %v829_v4 = vmax.f32 %v781_v59, 0.0  ;;  %907 = vst.msk [vmem:[#allocation2 + $0x88] sm:$0xff] (!%p2196_p0), %vm902_vm5, %v2674_v43 }
 0x12f   : > { %v787_v3 = vadd.f32 %v786_v2, %v589_v46  ;;  %v830_v7 = vmax.f32 %v783_v61, 0.0 }
 0x130   : > { %v831_v5 = vmax.f32 %v785_v0, 0.0 }
 0x131   : > { %v486_v6 = vpop.xlane.xlu0 %485  ;;  %v832_v8 = vmax.f32 %v787_v3, 0.0 }
 0x132   : > { %v851_v9 = vpack.c.bf16 %v831_v5, %v829_v4 }
 0x133   : > { %v490_v10 = vpop.xlane.xlu1 %489  ;;  %v852_v11 = vpack.c.bf16 %v832_v8, %v830_v7  ;;  %v790_v12 = vpop.f32.mrb[24].mxu0 }
 0x134   : > { %v492_v13 = vsel %vm491_vm3, %v486_v6, %v490_v10  ;;  %892 = vst [vmem:[#allocation2 + $0xa8] sm:$0xff] %v851_v9  ;;  %v791_v14 = vadd.f32 %v790_v12, %v594_v63  ;;  %v792_v15 = vpop.f32.mrb[25].mxu0 }
 0x135   : > { %494 = vst.msk [vmem:[%s465_s21] sm:$0xf] %vm493_vm4, %v492_v13  ;;  %v793_v16 = vadd.f32 %v792_v15, %v594_v63  ;;  %v794_v17 = vpop.f32.mrb[26].mxu0 }
 0x136   : > { %893 = vst.msk [vmem:[#allocation2 + $0xb0] sm:$0xff] %vm671_vm0, %v852_v11  ;;  %v795_v18 = vadd.f32 %v794_v17, %v599_v58  ;;  %v796_v19 = vpop.f32.mrb[27].mxu0  ;;  %v833_v21 = vmax.f32 %v791_v14, 0.0 }
 0x137   : > { %v797_v20 = vadd.f32 %v796_v19, %v599_v58  ;;  %v834_v23 = vmax.f32 %v793_v16, 0.0  ;;  %v604_v27 = vpop.permute.xlu1 %603  ;;  %908 = vst.msk [vmem:[#allocation2 + $0xa8] sm:$0xff] (!%p2196_p0), %vm902_vm5, %v2674_v43 }
 0x138   : > { %v835_v22 = vmax.f32 %v795_v18, 0.0 }
 0x139   : > { %v836_v24 = vmax.f32 %v797_v20, 0.0  ;;  %v609_v31 = vpop.permute.xlu0 %608 }
 0x13a   : > { %v853_v25 = vpack.c.bf16 %v835_v22, %v833_v21 }
 0x13b   : > { %v854_v26 = vpack.c.bf16 %v836_v24, %v834_v23  ;;  %v800_v28 = vpop.f32.mrb[28].mxu0 }
 0x13c   : > { %894 = vst [vmem:[#allocation2 + $0xc8] sm:$0xff] %v853_v25  ;;  %v801_v29 = vadd.f32 %v800_v28, %v604_v27  ;;  %v802_v30 = vpop.f32.mrb[29].mxu0 }
 0x13d   : > { %895 = vst.msk [vmem:[#allocation2 + $0xd0] sm:$0xff] %vm671_vm0, %v854_v26  ;;  %v803_v32 = vadd.f32 %v802_v30, %v604_v27  ;;  %v804_v33 = vpop.f32.mrb[30].mxu0 }
 0x13e   : > { %v805_v34 = vadd.f32 %v804_v33, %v609_v31  ;;  %v806_v35 = vpop.f32.mrb[31].mxu0  ;;  %v837_v37 = vmax.f32 %v801_v29, 0.0  ;;  %909 = vst.msk [vmem:[#allocation2 + $0xc8] sm:$0xff] (!%p2196_p0), %vm902_vm5, %v2674_v43 }
 0x13f   : > { %v807_v36 = vadd.f32 %v806_v35, %v609_v31  ;;  %v838_v39 = vmax.f32 %v803_v32, 0.0  ;;  %901 = sbr.rel (%p2196_p0) target bundleno = 327 (0x147), region = 60 }
 0x140   : > { %v839_v38 = vmax.f32 %v805_v34, 0.0 }
 0x141   : > { %v840_v40 = vmax.f32 %v807_v36, 0.0 }
 0x142   : > { %v855_v41 = vpack.c.bf16 %v839_v38, %v837_v37 }
 0x143   : > { %v856_v42 = vpack.c.bf16 %v840_v40, %v838_v39 }
 0x144   : > { %896 = vst [vmem:[#allocation2 + $0xe8] sm:$0xff] %v855_v41 }
 0x145   : > { %897 = vst.msk [vmem:[#allocation2 + $0xf0] sm:$0xff] %vm671_vm0, %v856_v42 }
 0x146   : > { %910 = vst.msk [vmem:[#allocation2 + $0xe8] sm:$0xff] %vm902_vm5, %v2674_v43 }
 0x147 PF: > { %p2197_p1 = scmp.ne.s32.totalorder %s2655_s16, 1 }
 0x148   : > { %vm915_vm6 = vcmask (!%p2197_p1), 261248   ;;  %v2675_v44 = vmov (!%p2197_p1), 0  }
 0x149   : > { %914 = sbr.rel (%p2197_p1) target bundleno = 336 (0x150), region = 64  ;;  %916 = vst.msk [vmem:[#allocation2 + $0x10] sm:$0xff] (!%p2197_p1), %vm915_vm6, %v2675_v44  ;;  %917 = vst.msk [vmem:[#allocation2 + $0x30] sm:$0xff] (!%p2197_p1), %vm915_vm6, %v2675_v44 }
 0x14a   : > { %918 = vst.msk [vmem:[#allocation2 + $0x50] sm:$0xff] (!%p2197_p1), %vm915_vm6, %v2675_v44  ;;  %919 = vst.msk [vmem:[#allocation2 + $0x70] sm:$0xff] (!%p2197_p1), %vm915_vm6, %v2675_v44 }
 0x14b   : > { %920 = vst.msk [vmem:[#allocation2 + $0x90] sm:$0xff] (!%p2197_p1), %vm915_vm6, %v2675_v44  ;;  %921 = vst.msk [vmem:[#allocation2 + $0xb0] sm:$0xff] (!%p2197_p1), %vm915_vm6, %v2675_v44 }
 0x14c   : > { %922 = vst.msk [vmem:[#allocation2 + $0xd0] sm:$0xff] (!%p2197_p1), %vm915_vm6, %v2675_v44  ;;  %923 = vst.msk [vmem:[#allocation2 + $0xf0] sm:$0xff] (!%p2197_p1), %vm915_vm6, %v2675_v44 }
 0x150 PF: > { %v924_v45 = vld [vmem:[%s3646_s8] sm:$0x1]  ;;  %v944_v46 = vlaneseq  ;;  %v2970_v47 = vld [vmem:[#allocation2 + $0x8] sm:$0xff]  ;;  %2576 = vset.pattern.permute.xlu0 %v2673_v1  ;;  %s2676_s3 = smov 112   ;;  %s2677_s15 = smov 127   ;;  %v2981_v55 = vld [vmem:[#allocation2 + $0x10] sm:$0xff] }
 0x151   : > { %v1132_v48 = vshrl.u32 %v924_v45, 16  ;;  %v942_v49 = vpack.i.b16 %v924_v45, %v924_v45  ;;  %1412 = vrot.lane.b32.xlu1 %v2970_v47, %s2676_s3  ;;  %s2678_s9 = smov 15   ;;  %s2679_s18 = smov 1   ;;  %v2977_v1 = vld [vmem:[#allocation2 + $0x28] sm:$0xff]  ;;  %v2985_v56 = vld [vmem:[#allocation2 + $0x30] sm:$0xff]  ;;  %v2683_v2 = vmov 0.0  }
 0x152   : > { %v945_v50 = vshrl.u32 %v944_v46, 7  ;;  %s2680_s19 = smov 17   ;;  %s2681_s20 = smov 31   ;;  %v2987_v57 = vld [vmem:[#allocation2 + $0x50] sm:$0xff]  ;;  %v2993_v58 = vld [vmem:[#allocation2 + $0x48] sm:$0xff]  ;;  %2292 = vmatprep.subr.bf16.mxu1 %v2683_v2  ;;  %2332 = vmatprep.subr.bf16.mxu0 %v2683_v2  ;;  %vm2684_vm7 = vmmov 0  }
 0x153   : > { %v1133_v52 = vpack.i.b16 %v1132_v48, %v1132_v48  ;;  %s2682_s13 = smov 33   ;;  %v2995_v59 = vld [vmem:[#allocation2 + $0x70] sm:$0xff]  ;;  %v3001_v60 = vld [vmem:[#allocation2 + $0x68] sm:$0xff]  ;;  %2293 = vmatpush3.bf16.msra.mxu1 %v2970_v47  ;;  %v2198_v5 = vld [vmem:[%s3644_s6 + $0x4] sm:$0xf]  ;;  %2308 = vmatprep.mubr.msk.bf16.mxu1 %vm2684_vm7, %v2683_v2  ;;  %s2685_s22 = smov 113  }
 0x154   : > { %v946_v51 = vsub.s32 0, %v945_v50  ;;  %v3003_v61 = vld [vmem:[#allocation2 + $0x90] sm:$0xff]  ;;  %v3009_v62 = vld [vmem:[#allocation2 + $0x88] sm:$0xff]  ;;  %2294 = vmatprep.subr.bf16.mxu1 %v2683_v2  ;;  %2348 = vmatprep.mubr.msk.bf16.mxu0 %vm2684_vm7, %v2683_v2  ;;  %v925_v6 = vld [vmem:[#allocation2] sm:$0xff]  ;;  %s2686_s30 = smov 111   ;;  %s2687_s28 = smov 97  }
 0x155   : > { %v3011_v63 = vld [vmem:[#allocation2 + $0xb0] sm:$0xff]  ;;  %v3017_v0 = vld [vmem:[#allocation2 + $0xa8] sm:$0xff]  ;;  %v927_v13 = vld [vmem:[#allocation2 + $0x20] sm:$0xff]  ;;  %vm1209_vm8 = vcmask 1039360   ;;  %s2688_s12 = smov 96   ;;  %s2689_s21 = smov 95  }
 0x156   : > { %v947_v53 = vrot.slane %v942_v49, %v946_v51  ;;  %v1138_v54 = vrot.slane %v1133_v52, %v946_v51  ;;  %v3035_v3 = vld [vmem:[#allocation2 + $0xc8] sm:$0xff]  ;;  %v929_v18 = vld [vmem:[#allocation2 + $0x40] sm:$0xff]  ;;  %v3125_v41 = vld [vmem:[#allocation2 + $0xd0] sm:$0xff]  ;;  %vm1336_vm9 = vcmask 924672   ;;  %vm1444_vm10 = vcmask 916480  }
 0x157   : > { %2295 = vmatpush3.bf16.msra.mxu1 %v2977_v1  ;;  %v3039_v4 = vld [vmem:[#allocation2 + $0xe8] sm:$0xff]  ;;  %v931_v23 = vld [vmem:[#allocation2 + $0x60] sm:$0xff]  ;;  %v3140_v49 = vld [vmem:[#allocation2 + $0xf0] sm:$0xff]  ;;  %vm1571_vm11 = vcmask 908288   ;;  %vm1698_vm12 = vcmask 793600   ;;  %vm1790_vm13 = vcmask 785408  }
 0x158   : > { %949 = vrot.lane.b32.xlu0 %v947_v53, %s2677_s15  ;;  %1267 = vrot.lane.b32.xlu1 %v947_v53, %s2678_s9  ;;  %v933_v28 = vld [vmem:[#allocation2 + $0x80] sm:$0xff]  ;;  %vm1917_vm14 = vcmask 777216  }
 0x159   : > { %2296 = vmatprep.subr.bf16.mxu1 %v2683_v2  ;;  %v935_v33 = vld [vmem:[#allocation2 + $0xa0] sm:$0xff] }
 0x15a   : > { %v937_v38 = vld [vmem:[#allocation2 + $0xc0] sm:$0xff] }
 0x15b   : > { %2297 = vmatpush3.bf16.msra.mxu1 %v2993_v58  ;;  %v939_v44 = vld [vmem:[#allocation2 + $0xe0] sm:$0xff] }
 0x15c   : > { %1140 = vrot.lane.b32.xlu0 %v1138_v54, %s2679_s18  ;;  %1502 = vrot.lane.b32.xlu1 %v1138_v54, %s2680_s19 }
 0x15d   : > { %2298 = vmatprep.subr.bf16.mxu1 %v2683_v2 }
 0x15f   : > { %2299 = vmatpush3.bf16.msra.mxu1 %v3001_v60 }
 0x160   : > { %1629 = vrot.lane.b32.xlu0 %v947_v53, %s2681_s20  ;;  %1416 = vrot.lane.b32.xlu1 %v2977_v1, %s2676_s3  ;;  %s3674_s20 = sld [smem:[#allocation16_spill]] }
 0x161   : > { %2300 = vmatprep.subr.bf16.mxu1 %v2683_v2 }
 0x163   : > { %2301 = vmatpush3.bf16.msra.mxu1 %v3009_v62 }
 0x164   : > { %1414 = vrot.lane.b32.xlu0 %v2981_v55, %s2676_s3  ;;  %1848 = vrot.lane.b32.xlu1 %v1138_v54, %s2682_s13 }
 0x165   : > { %2302 = vmatprep.subr.bf16.mxu1 %v2683_v2 }
 0x166   : > { %s3675_s27 = smov %s3674_s20 }
 0x167   : > { %2303 = vmatpush3.bf16.msra.mxu1 %v3017_v0 }
 0x168   : > { %1418 = vrot.lane.b32.xlu0 %v2985_v56, %s2676_s3  ;;  %1422 = vrot.lane.b32.xlu1 %v2987_v57, %s2676_s3 }
 0x169   : > { %2304 = vmatprep.subr.bf16.mxu1 %v2683_v2 }
 0x16b   : > { %2305 = vmatpush3.bf16.msra.mxu1 %v3035_v3 }
 0x16c   : > { %1420 = vrot.lane.b32.xlu0 %v2993_v58, %s2676_s3  ;;  %1426 = vrot.lane.b32.xlu1 %v2995_v59, %s2676_s3 }
 0x16d   : > { %2306 = vmatprep.subr.bf16.mxu1 %v2683_v2 }
 0x16f   : > { %2307 = vmatpush3.bf16.msra.mxu1 %v3039_v4 }
 0x170   : > { %1424 = vrot.lane.b32.xlu0 %v3001_v60, %s2676_s3  ;;  %1430 = vrot.lane.b32.xlu1 %v3003_v61, %s2676_s3 }
 0x171   : > { %2312 = vmatprep.subr.bf16.mxu1 %v2683_v2 }
 0x172   : > { %2309 = vmatmul.mubr.bf16.vlgmr.msra.gmra.mrb[0].mxu1 %v2198_v5 }
 0x173   : > { %2328 = vmatprep.mubr.msk.bf16.mxu1 %vm2684_vm7, %v2683_v2 }
 0x174   : > { %1428 = vrot.lane.b32.xlu0 %v3009_v62, %s2676_s3  ;;  %1434 = vrot.lane.b32.xlu1 %v3011_v63, %s2676_s3 }
 0x178   : > { %1432 = vrot.lane.b32.xlu0 %v3017_v0, %s2676_s3 }
 0x1c3   : > { %v3133_v45 = vpop.permute.xlu1 %1412 }
 0x1ca   : > { %v3052_v7 = vpop.permute.xlu0 %949  ;;  %v1268_v50 = vpop.permute.xlu1 %1267 }
 0x1cb   : > { %v953_v8 = vmul.bf16 %v2970_v47, %v3052_v7  ;;  %v952_v9 = vmul.bf16 %v3052_v7, %v925_v6  ;;  %v955_v14 = vmul.bf16 %v2977_v1, %v3052_v7  ;;  %v954_v15 = vmul.bf16 %v3052_v7, %v927_v13 }
 0x1cc   : > { %v957_v19 = vmul.bf16 %v2993_v58, %v3052_v7  ;;  %v956_v20 = vmul.bf16 %v3052_v7, %v929_v18  ;;  %v959_v24 = vmul.bf16 %v3001_v60, %v3052_v7  ;;  %v958_v25 = vmul.bf16 %v3052_v7, %v931_v23 }
 0x1cd   : > { %1029 = vrot.lane.b32.xlu0 %v953_v8, %s2679_s18  ;;  %1027 = vrot.lane.b32.xlu1 %v952_v9, %s2679_s18  ;;  %v961_v29 = vmul.bf16 %v3009_v62, %v3052_v7  ;;  %v960_v30 = vmul.bf16 %v3052_v7, %v933_v28  ;;  %v963_v34 = vmul.bf16 %v3017_v0, %v3052_v7 }
 0x1ce   : > { %v3059_v10 = vpop.permute.xlu0 %1140  ;;  %v962_v35 = vmul.bf16 %v3052_v7, %v935_v33  ;;  %v965_v39 = vmul.bf16 %v3052_v7, %v3035_v3  ;;  %v964_v40 = vmul.bf16 %v3052_v7, %v937_v38  ;;  %v967_v46 = vmul.bf16 %v3052_v7, %v3039_v4  ;;  %v3162_v9 = vpop.permute.xlu1 %1502 }
 0x1cf   : > { %v1144_v11 = vmul.bf16 %v3059_v10, %v2981_v55  ;;  %v1143_v12 = vmul.bf16 %v3059_v10, %v2970_v47  ;;  %v1145_v16 = vmul.bf16 %v3059_v10, %v2977_v1  ;;  %v1146_v17 = vmul.bf16 %v3059_v10, %v2985_v56 }
 0x1d0   : > { %v1148_v21 = vmul.bf16 %v3059_v10, %v2987_v57  ;;  %v1147_v22 = vmul.bf16 %v3059_v10, %v2993_v58  ;;  %v1150_v26 = vmul.bf16 %v3059_v10, %v2995_v59  ;;  %v1149_v27 = vmul.bf16 %v3059_v10, %v3001_v60 }
 0x1d1   : > { %1179 = vrot.lane.b32.xlu0 %v1144_v11, %s2677_s15  ;;  %1177 = vrot.lane.b32.xlu1 %v1143_v12, %s2677_s15  ;;  %v1152_v31 = vmul.bf16 %v3059_v10, %v3003_v61  ;;  %v1151_v32 = vmul.bf16 %v3059_v10, %v3009_v62  ;;  %v1154_v36 = vmul.bf16 %v3059_v10, %v3011_v63 }
 0x1d2   : > { %v1153_v37 = vmul.bf16 %v3059_v10, %v3017_v0  ;;  %v1156_v42 = vmul.bf16 %v3059_v10, %v3125_v41  ;;  %v1155_v43 = vmul.bf16 %v3059_v10, %v3035_v3  ;;  %v966_v48 = vmul.bf16 %v3052_v7, %v939_v44  ;;  %v3166_v12 = vpop.permute.xlu0 %1629 }
 0x1d3   : > { %v1158_v51 = vmul.bf16 %v3059_v10, %v3140_v49  ;;  %v1157_v52 = vmul.bf16 %v3059_v10, %v3039_v4  ;;  %v1271_v53 = vmul.bf16 %v1268_v50, %v2981_v55  ;;  %v1270_v54 = vmul.bf16 %v1268_v50, %v2970_v47 }
 0x1d4   : > { %v1273_v5 = vmul.bf16 %v1268_v50, %v2985_v56  ;;  %v1272_v6 = vmul.bf16 %v1268_v50, %v2977_v1  ;;  %v1274_v7 = vmul.bf16 %v1268_v50, %v2993_v58  ;;  %v1275_v8 = vmul.bf16 %v1268_v50, %v2987_v57 }
 0x1d5   : > { %1033 = vrot.lane.b32.xlu0 %v955_v14, %s2679_s18  ;;  %1031 = vrot.lane.b32.xlu1 %v954_v15, %s2679_s18  ;;  %v1276_v10 = vmul.bf16 %v1268_v50, %v3001_v60  ;;  %v1277_v11 = vmul.bf16 %v1268_v50, %v2995_v59  ;;  %v1278_v13 = vmul.bf16 %v1268_v50, %v3009_v62  ;;  %v3172_v15 = vpop.permute.xlu1 %1416 }
 0x1d6   : > { %v1279_v14 = vmul.bf16 %v1268_v50, %v3003_v61  ;;  %v1281_v18 = vmul.bf16 %v1268_v50, %v3011_v63  ;;  %v1633_v33 = vmul.bf16 %v3166_v12, %v2981_v55  ;;  %v1507_v38 = vmul.bf16 %v3162_v9, %v2977_v1 }
 0x1d9   : > { %1181 = vrot.lane.b32.xlu0 %v1145_v16, %s2677_s15  ;;  %1183 = vrot.lane.b32.xlu1 %v1146_v17, %s2677_s15  ;;  %v3176_v16 = vpop.permute.xlu0 %1414  ;;  %v1280_v17 = vmul.bf16 %v1268_v50, %v3017_v0 }
 0x1dd   : > { %1037 = vrot.lane.b32.xlu0 %v957_v19, %s2679_s18  ;;  %1035 = vrot.lane.b32.xlu1 %v956_v20, %s2679_s18  ;;  %v3182_v19 = vpop.permute.xlu1 %1848  ;;  %v1282_v20 = vmul.bf16 %v1268_v50, %v3035_v3 }
 0x1e1   : > { %1187 = vrot.lane.b32.xlu0 %v1148_v21, %s2677_s15  ;;  %1185 = vrot.lane.b32.xlu1 %v1147_v22, %s2677_s15  ;;  %v1283_v21 = vmul.bf16 %v1268_v50, %v3125_v41  ;;  %v3186_v22 = vpop.permute.xlu0 %1418  ;;  %v3190_v23 = vpop.permute.xlu1 %1422 }
 0x1e5   : > { %1041 = vrot.lane.b32.xlu0 %v959_v24, %s2679_s18  ;;  %1039 = vrot.lane.b32.xlu1 %v958_v25, %s2679_s18  ;;  %v3192_v24 = vpop.permute.xlu0 %1420  ;;  %v1284_v25 = vmul.bf16 %v1268_v50, %v3039_v4 }
 0x1e9   : > { %1191 = vrot.lane.b32.xlu0 %v1150_v26, %s2677_s15  ;;  %1189 = vrot.lane.b32.xlu1 %v1149_v27, %s2677_s15  ;;  %v1285_v26 = vmul.bf16 %v1268_v50, %v3140_v49  ;;  %v3202_v27 = vpop.permute.xlu1 %1426  ;;  %v3204_v28 = vpop.permute.xlu0 %1424  ;;  %v1510_v50 = vmul.bf16 %v3162_v9, %v2987_v57 }
 0x1ed   : > { %1045 = vrot.lane.b32.xlu0 %v961_v29, %s2679_s18  ;;  %1043 = vrot.lane.b32.xlu1 %v960_v30, %s2679_s18  ;;  %v1505_v29 = vmul.bf16 %v3162_v9, %v2970_v47  ;;  %v1506_v30 = vmul.bf16 %v3162_v9, %v2981_v55 }
 0x1f1   : > { %1195 = vrot.lane.b32.xlu0 %v1152_v31, %s2677_s15  ;;  %1193 = vrot.lane.b32.xlu1 %v1151_v32, %s2677_s15  ;;  %v3214_v31 = vpop.permute.xlu1 %1430  ;;  %v3216_v32 = vpop.permute.xlu0 %1428 }
 0x1f5   : > { %1049 = vrot.lane.b32.xlu0 %v963_v34, %s2679_s18  ;;  %1047 = vrot.lane.b32.xlu1 %v962_v35, %s2679_s18  ;;  %v1632_v34 = vmul.bf16 %v3166_v12, %v2970_v47  ;;  %v3226_v35 = vpop.permute.xlu1 %1434 }
 0x1f9   : > { %1199 = vrot.lane.b32.xlu0 %v1154_v36, %s2677_s15  ;;  %1197 = vrot.lane.b32.xlu1 %v1153_v37, %s2677_s15  ;;  %v3228_v36 = vpop.permute.xlu0 %1432  ;;  %v1508_v37 = vmul.bf16 %v3162_v9, %v2985_v56 }
 0x1fd   : > { %1053 = vrot.lane.b32.xlu0 %v965_v39, %s2679_s18  ;;  %1051 = vrot.lane.b32.xlu1 %v964_v40, %s2679_s18 }
 0x201   : > { %1203 = vrot.lane.b32.xlu0 %v1156_v42, %s2677_s15  ;;  %1201 = vrot.lane.b32.xlu1 %v1155_v43, %s2677_s15  ;;  %v1635_v42 = vmul.bf16 %v3166_v12, %v2985_v56  ;;  %v1634_v43 = vmul.bf16 %v3166_v12, %v2977_v1 }
 0x205   : > { %1057 = vrot.lane.b32.xlu0 %v967_v46, %s2679_s18  ;;  %1055 = vrot.lane.b32.xlu1 %v966_v48, %s2679_s18  ;;  %s2008_s18 = sshll.u32 %s423_s29, 4  ;;  %s3583_s18 = int_to_ptr.vmem [resolvable:$true] %s2008_s18 }
 0x209   : > { %1207 = vrot.lane.b32.xlu0 %v1158_v51, %s2677_s15  ;;  %1205 = vrot.lane.b32.xlu1 %v1157_v52, %s2677_s15  ;;  %v1509_v51 = vmul.bf16 %v3162_v9, %v2993_v58 }
 0x20d   : > { %1306 = vrot.lane.b32.xlu0 %v1271_v53, %s2685_s22  ;;  %1304 = vrot.lane.b32.xlu1 %v1270_v54, %s2685_s22 }
 0x211   : > { %1310 = vrot.lane.b32.xlu0 %v1273_v5, %s2685_s22  ;;  %1308 = vrot.lane.b32.xlu1 %v1272_v6, %s2685_s22  ;;  %v1637_v5 = vmul.bf16 %v3166_v12, %v2987_v57  ;;  %v1636_v6 = vmul.bf16 %v3166_v12, %v2993_v58 }
 0x215   : > { %1312 = vrot.lane.b32.xlu0 %v1274_v7, %s2685_s22  ;;  %1314 = vrot.lane.b32.xlu1 %v1275_v8, %s2685_s22 }
 0x219   : > { %1316 = vrot.lane.b32.xlu0 %v1276_v10, %s2685_s22  ;;  %1318 = vrot.lane.b32.xlu1 %v1277_v11, %s2685_s22  ;;  %v1512_v11 = vmul.bf16 %v3162_v9, %v2995_v59 }
 0x21d   : > { %1320 = vrot.lane.b32.xlu0 %v1278_v13, %s2685_s22  ;;  %1322 = vrot.lane.b32.xlu1 %v1279_v14, %s2685_s22  ;;  %v1511_v13 = vmul.bf16 %v3162_v9, %v3001_v60 }
 0x221   : > { %1324 = vrot.lane.b32.xlu0 %v1280_v17, %s2685_s22  ;;  %1326 = vrot.lane.b32.xlu1 %v1281_v18, %s2685_s22 }
 0x225   : > { %1328 = vrot.lane.b32.xlu0 %v1282_v20, %s2685_s22  ;;  %1330 = vrot.lane.b32.xlu1 %v1283_v21, %s2685_s22  ;;  %v1639_v20 = vmul.bf16 %v3166_v12, %v2995_v59  ;;  %v1638_v21 = vmul.bf16 %v3166_v12, %v3001_v60 }
 0x229   : > { %1436 = vrot.lane.b32.xlu0 %v3035_v3, %s2676_s3  ;;  %1438 = vrot.lane.b32.xlu1 %v3125_v41, %s2676_s3 }
 0x22d   : > { %1332 = vrot.lane.b32.xlu0 %v1284_v25, %s2685_s22  ;;  %1334 = vrot.lane.b32.xlu1 %v1285_v26, %s2685_s22  ;;  %s2577_s22 = scalar_lea.vmem %s3583_s18, 64 }
 0x22e   : > { %p2578_p2 = scmp.ne.s32.totalorder %s3583_s18, %s2577_s22 }
 0x230   : > { %p2579_p4 = pnand %p2578_p2, %p2797_p3 }
 0x231   : > { %1440 = vrot.lane.b32.xlu0 %v3039_v4, %s2676_s3  ;;  %1442 = vrot.lane.b32.xlu1 %v3140_v49, %s2676_s3  ;;  %s2207_s3 = sshll.u32 %s2659_s17, 1 }
 0x232   : > { %s2004_s15 = sadd.s32 %s2655_s16, %s2207_s3  ;;  %s3676_s16 = sand.u32 1, %s2647_s14  }
 0x233   : > { %s2208_s9 = sshll.u32 %s2004_s15, 6  ;;  %s1985_s11 = scalar_lea.sflag [#allocation4], %s3676_s16 }
 0x234   : > { %s3581_s13 = scalar_lea.hbm %s3674_s20, %s2208_s9  ;;  %p2580_p5 = pneg %p2579_p4 }
 0x235   : > { %1539 = vrot.lane.b32.xlu0 %v1505_v29, %s2686_s30  ;;  %1541 = vrot.lane.b32.xlu1 %v1506_v30, %s2686_s30  ;;  %v1514_v30 = vmul.bf16 %v3162_v9, %v3003_v61 }
 0x239   : > { %1668 = vrot.lane.b32.xlu1 %v1633_v33, %s2687_s28  ;;  %1666 = vrot.lane.b32.xlu0 %v1632_v34, %s2687_s28  ;;  %v1513_v33 = vmul.bf16 %v3162_v9, %v3009_v62 }
 0x23d   : > { %1545 = vrot.lane.b32.xlu1 %v1508_v37, %s2686_s30  ;;  %1543 = vrot.lane.b32.xlu0 %v1507_v38, %s2686_s30 }
 0x23f   : > { %v1028_v39 = vpop.permute.xlu1 %1027  ;;  %v1030_v40 = vpop.permute.xlu0 %1029 }
 0x240   : > { %v1060_v44 = vsel %vm491_vm3, %v1028_v39, %v1030_v40  ;;  %v1641_v39 = vmul.bf16 %v3166_v12, %v3003_v61  ;;  %v1640_v40 = vmul.bf16 %v3166_v12, %v3009_v62 }
 0x241   : > { %1672 = vrot.lane.b32.xlu1 %v1635_v42, %s2687_s28  ;;  %1670 = vrot.lane.b32.xlu0 %v1634_v43, %s2687_s28 }
 0x242   : > { %2313 = vmatpush3.bf16.msra.mxu1 %v1060_v44 }
 0x243   : > { %v1178_v46 = vpop.permute.xlu1 %1177  ;;  %v1180_v48 = vpop.permute.xlu0 %1179  ;;  %2314 = vmatprep.subr.bf16.mxu1 %v2683_v2 }
 0x244   : > { %v1210_v52 = vsel %vm1209_vm8, %v1178_v46, %v1180_v48  ;;  %v1516_v46 = vmul.bf16 %v3162_v9, %v3011_v63  ;;  %v1515_v48 = vmul.bf16 %v3162_v9, %v3017_v0 }
 0x245   : > { %1549 = vrot.lane.b32.xlu1 %v1510_v50, %s2686_s30  ;;  %1547 = vrot.lane.b32.xlu0 %v1509_v51, %s2686_s30 }
 0x246   : > { %2333 = vmatpush3.bf16.msra.mxu0 %v1210_v52 }
 0x247   : > { %v1032_v53 = vpop.permute.xlu1 %1031  ;;  %v1034_v54 = vpop.permute.xlu0 %1033  ;;  %2334 = vmatprep.subr.bf16.mxu0 %v2683_v2 }
 0x248   : > { %v1061_v7 = vsel %vm491_vm3, %v1032_v53, %v1034_v54  ;;  %v1643_v53 = vmul.bf16 %v3166_v12, %v3011_v63  ;;  %v1642_v54 = vmul.bf16 %v3166_v12, %v3017_v0 }
 0x249   : > { %1676 = vrot.lane.b32.xlu1 %v1637_v5, %s2687_s28  ;;  %1674 = vrot.lane.b32.xlu0 %v1636_v6, %s2687_s28 }
 0x24a   : > { %2315 = vmatpush3.bf16.msra.mxu1 %v1061_v7 }
 0x24b   : > { %v1184_v8 = vpop.permute.xlu1 %1183  ;;  %v1182_v10 = vpop.permute.xlu0 %1181  ;;  %2316 = vmatprep.subr.bf16.mxu1 %v2683_v2 }
 0x24c   : > { %v1211_v14 = vsel %vm1209_vm8, %v1182_v10, %v1184_v8  ;;  %v1518_v8 = vmul.bf16 %v3162_v9, %v3125_v41  ;;  %v1517_v10 = vmul.bf16 %v3162_v9, %v3035_v3 }
 0x24d   : > { %1553 = vrot.lane.b32.xlu1 %v1512_v11, %s2686_s30  ;;  %1551 = vrot.lane.b32.xlu0 %v1511_v13, %s2686_s30 }
 0x24e   : > { %2335 = vmatpush3.bf16.msra.mxu0 %v1211_v14 }
 0x24f   : > { %v1036_v17 = vpop.permute.xlu1 %1035  ;;  %v1038_v18 = vpop.permute.xlu0 %1037  ;;  %2336 = vmatprep.subr.bf16.mxu0 %v2683_v2 }
 0x250   : > { %v1062_v25 = vsel %vm491_vm3, %v1036_v17, %v1038_v18  ;;  %v1645_v17 = vmul.bf16 %v3166_v12, %v3125_v41  ;;  %v1644_v18 = vmul.bf16 %v3166_v12, %v3035_v3 }
 0x251   : > { %1680 = vrot.lane.b32.xlu1 %v1639_v20, %s2687_s28  ;;  %1678 = vrot.lane.b32.xlu0 %v1638_v21, %s2687_s28 }
 0x252   : > { %2317 = vmatpush3.bf16.msra.mxu1 %v1062_v25 }
 0x253   : > { %v1186_v26 = vpop.permute.xlu1 %1185  ;;  %v1188_v29 = vpop.permute.xlu0 %1187  ;;  %2318 = vmatprep.subr.bf16.mxu1 %v2683_v2 }
 0x254   : > { %v1212_v34 = vsel %vm1209_vm8, %v1186_v26, %v1188_v29  ;;  %v1520_v26 = vmul.bf16 %v3162_v9, %v3140_v49  ;;  %v1519_v29 = vmul.bf16 %v3162_v9, %v3039_v4 }
 0x255   : > { %1557 = vrot.lane.b32.xlu1 %v1514_v30, %s2686_s30  ;;  %1555 = vrot.lane.b32.xlu0 %v1513_v33, %s2686_s30 }
 0x256   : > { %2337 = vmatpush3.bf16.msra.mxu0 %v1212_v34 }
 0x257   : > { %v1040_v37 = vpop.permute.xlu1 %1039  ;;  %v1042_v38 = vpop.permute.xlu0 %1041  ;;  %2338 = vmatprep.subr.bf16.mxu0 %v2683_v2 }
 0x258   : > { %v1063_v42 = vsel %vm491_vm3, %v1040_v37, %v1042_v38  ;;  %v1647_v37 = vmul.bf16 %v3166_v12, %v3140_v49  ;;  %v1646_v38 = vmul.bf16 %v3166_v12, %v3039_v4 }
 0x259   : > { %1684 = vrot.lane.b32.xlu1 %v1641_v39, %s2687_s28  ;;  %1682 = vrot.lane.b32.xlu0 %v1640_v40, %s2687_s28 }
 0x25a   : > { %2319 = vmatpush3.bf16.msra.mxu1 %v1063_v42 }
 0x25b   : > { %v1190_v43 = vpop.permute.xlu1 %1189  ;;  %v1192_v44 = vpop.permute.xlu0 %1191  ;;  %2320 = vmatprep.subr.bf16.mxu1 %v2683_v2 }
 0x25c   : > { %v1213_v50 = vsel %vm1209_vm8, %v1190_v43, %v1192_v44  ;;  %v1852_v44 = vmul.bf16 %v3182_v19, %v2981_v55 }
 0x25d   : > { %1561 = vrot.lane.b32.xlu1 %v1516_v46, %s2686_s30  ;;  %1559 = vrot.lane.b32.xlu0 %v1515_v48, %s2686_s30  ;;  %v1851_v46 = vmul.bf16 %v3182_v19, %v2970_v47 }
 0x25e   : > { %2339 = vmatpush3.bf16.msra.mxu0 %v1213_v50 }
 0x25f   : > { %v1044_v51 = vpop.permute.xlu1 %1043  ;;  %v1046_v52 = vpop.permute.xlu0 %1045  ;;  %2340 = vmatprep.subr.bf16.mxu0 %v2683_v2 }
 0x260   : > { %v1064_v5 = vsel %vm491_vm3, %v1044_v51, %v1046_v52 }
 0x261   : > { %1688 = vrot.lane.b32.xlu1 %v1643_v53, %s2687_s28  ;;  %1686 = vrot.lane.b32.xlu0 %v1642_v54, %s2687_s28  ;;  %v1854_v54 = vmul.bf16 %v3182_v19, %v2985_v56 }
 0x262   : > { %2321 = vmatpush3.bf16.msra.mxu1 %v1064_v5  ;;  %v1853_v5 = vmul.bf16 %v3182_v19, %v2977_v1 }
 0x263   : > { %v1194_v6 = vpop.permute.xlu1 %1193  ;;  %v1196_v7 = vpop.permute.xlu0 %1195  ;;  %2322 = vmatprep.subr.bf16.mxu1 %v2683_v2 }
 0x264   : > { %v1214_v11 = vsel %vm1209_vm8, %v1194_v6, %v1196_v7  ;;  %v2199_v6 = vld [vmem:[%s3644_s6 + $0x8] sm:$0xf] }
 0x265   : > { %1565 = vrot.lane.b32.xlu1 %v1518_v8, %s2686_s30  ;;  %1563 = vrot.lane.b32.xlu0 %v1517_v10, %s2686_s30 }
 0x266   : > { %2341 = vmatpush3.bf16.msra.mxu0 %v1214_v11 }
 0x267   : > { %v1048_v13 = vpop.permute.xlu1 %1047  ;;  %v1050_v14 = vpop.permute.xlu0 %1049  ;;  %2342 = vmatprep.subr.bf16.mxu0 %v2683_v2 }
 0x268   : > { %v1065_v20 = vsel %vm491_vm3, %v1048_v13, %v1050_v14  ;;  %v1856_v13 = vmul.bf16 %v3182_v19, %v2987_v57  ;;  %v1855_v14 = vmul.bf16 %v3182_v19, %v2993_v58 }
 0x269   : > { %1692 = vrot.lane.b32.xlu1 %v1645_v17, %s2687_s28  ;;  %1690 = vrot.lane.b32.xlu0 %v1644_v18, %s2687_s28 }
 0x26a   : > { %2323 = vmatpush3.bf16.msra.mxu1 %v1065_v20  ;;  %v1858_v20 = vmul.bf16 %v3182_v19, %v2995_v59 }
 0x26b   : > { %v1198_v21 = vpop.permute.xlu1 %1197  ;;  %v1200_v25 = vpop.permute.xlu0 %1199  ;;  %2324 = vmatprep.subr.bf16.mxu1 %v2683_v2 }
 0x26c   : > { %v1215_v30 = vsel %vm1209_vm8, %v1198_v21, %v1200_v25  ;;  %v1857_v21 = vmul.bf16 %v3182_v19, %v3001_v60 }
 0x26d   : > { %1569 = vrot.lane.b32.xlu1 %v1520_v26, %s2686_s30  ;;  %1567 = vrot.lane.b32.xlu0 %v1519_v29, %s2686_s30  ;;  %v1860_v29 = vmul.bf16 %v3182_v19, %v3003_v61  ;;  %s2690_s30 = smov [#allocation3]  }
 0x26e   : > { %2343 = vmatpush3.bf16.msra.mxu0 %v1215_v30  ;;  %v1859_v30 = vmul.bf16 %v3182_v19, %v3009_v62 }
 0x26f   : > { %v1052_v33 = vpop.permute.xlu1 %1051  ;;  %v1054_v34 = vpop.permute.xlu0 %1053  ;;  %2344 = vmatprep.subr.bf16.mxu0 %v2683_v2 }
 0x270   : > { %v1066_v9 = vsel %vm491_vm3, %v1052_v33, %v1054_v34 }
 0x271   : > { %1696 = vrot.lane.b32.xlu1 %v1647_v37, %s2687_s28  ;;  %1694 = vrot.lane.b32.xlu0 %v1646_v38, %s2687_s28  ;;  %v1862_v37 = vmul.bf16 %v3182_v19, %v3011_v63  ;;  %v1861_v38 = vmul.bf16 %v3182_v19, %v3017_v0  ;;  %s2581_s28 = sshll.u32 %s2690_s30, 4  ;;  %s2582_s28 = int_to_ptr.vmem [resolvable:$false] %s2581_s28 }
 0x272   : > { %2325 = vmatpush3.bf16.msra.mxu1 %v1066_v9  ;;  %p2584_p6 = scmp.lt.s32.totalorder %s3583_s18, %s2582_s28 }
 0x273   : > { %v1202_v39 = vpop.permute.xlu1 %1201  ;;  %v1204_v40 = vpop.permute.xlu0 %1203  ;;  %2326 = vmatprep.subr.bf16.mxu1 %v2683_v2 }
 0x274   : > { %v1216_v42 = vsel %vm1209_vm8, %v1202_v39, %v1204_v40 }
 0x275   : > { %1760 = vrot.lane.b32.xlu1 %v2981_v55, %s2688_s12  ;;  %1758 = vrot.lane.b32.xlu0 %v2970_v47, %s2688_s12  ;;  %v968_v55 = vld [vmem:[%s3644_s6] sm:$0xf] }
 0x276   : > { %2345 = vmatpush3.bf16.msra.mxu0 %v1216_v42 }
 0x277   : > { %v1056_v12 = vpop.permute.xlu1 %1055  ;;  %v1058_v43 = vpop.permute.xlu0 %1057  ;;  %2346 = vmatprep.subr.bf16.mxu0 %v2683_v2 }
 0x278   : > { %v1067_v48 = vsel %vm491_vm3, %v1056_v12, %v1058_v43  ;;  %v1864_v43 = vmul.bf16 %v3182_v19, %v3125_v41 }
 0x279   : > { %1887 = vrot.lane.b32.xlu1 %v1852_v44, %s2689_s21  ;;  %1885 = vrot.lane.b32.xlu0 %v1851_v46, %s2689_s21  ;;  %v1863_v44 = vmul.bf16 %v3182_v19, %v3035_v3  ;;  %v2201_v46 = vld [vmem:[%s3644_s6 + $0x10] sm:$0xf] }
 0x27a   : > { %2327 = vmatpush3.bf16.msra.mxu1 %v1067_v48 }
 0x27b   : > { %v1206_v50 = vpop.permute.xlu1 %1205  ;;  %v1208_v51 = vpop.permute.xlu0 %1207  ;;  %2352 = vmatprep.subr.bf16.mxu1 %v2683_v2 }
 0x27c   : > { %v1217_v47 = vsel %vm1209_vm8, %v1206_v50, %v1208_v51  ;;  %v3477_v50 = vpop.f32.mrb[0].mxu1 }
 0x27d   : > { %1764 = vrot.lane.b32.xlu1 %v2985_v56, %s2688_s12  ;;  %1762 = vrot.lane.b32.xlu0 %v2977_v1, %s2688_s12  ;;  %v1445_v56 = vsel %vm1444_vm10, %v3133_v45, %v3176_v16  ;;  %v1446_v45 = vsel %vm1444_vm10, %v3172_v15, %v3186_v22  ;;  %v1447_v15 = vsel %vm1444_vm10, %v3192_v24, %v3190_v23 }
 0x27e   : > { %2347 = vmatpush3.bf16.msra.mxu0 %v1217_v47  ;;  %2329 = vmatmul.mubr.bf16.vlgmr.msra.gmra.mrb[4].mxu1 %v968_v55 }
 0x27f   : > { %v1305_v52 = vpop.permute.xlu1 %1304  ;;  %v1307_v53 = vpop.permute.xlu0 %1306  ;;  %2372 = vmatprep.subr.bf16.mxu0 %v2683_v2  ;;  %2368 = vmatprep.mubr.msk.bf16.mxu1 %vm2684_vm7, %v2683_v2 }
 0x280   : > { %v1337_v7 = vsel %vm1336_vm9, %v1305_v52, %v1307_v53 }
 0x281   : > { %1891 = vrot.lane.b32.xlu1 %v1854_v54, %s2689_s21  ;;  %1889 = vrot.lane.b32.xlu0 %v1853_v5, %s2689_s21  ;;  %v1866_v5 = vmul.bf16 %v3182_v19, %v3140_v49 }
 0x282   : > { %2349 = vmatmul.mubr.bf16.vlgmr.msra.gmra.mrb[32].mxu0 %v2199_v6  ;;  %2353 = vmatpush3.bf16.msra.mxu1 %v1337_v7  ;;  %v1865_v6 = vmul.bf16 %v3182_v19, %v3039_v4 }
 0x283   : > { %2373 = vmatpush3.bf16.msra.mxu0 %v1445_v56  ;;  %v1309_v1 = vpop.permute.xlu1 %1308  ;;  %v1311_v8 = vpop.permute.xlu0 %1310  ;;  %2354 = vmatprep.subr.bf16.mxu1 %v2683_v2 }
 0x284   : > { %v1338_v10 = vsel %vm1336_vm9, %v1309_v1, %v1311_v8  ;;  %2374 = vmatprep.subr.bf16.mxu0 %v2683_v2  ;;  %2388 = vmatprep.mubr.msk.bf16.mxu0 %vm2684_vm7, %v2683_v2 }
 0x285   : > { %1768 = vrot.lane.b32.xlu1 %v2987_v57, %s2688_s12  ;;  %1766 = vrot.lane.b32.xlu0 %v2993_v58, %s2688_s12  ;;  %v1448_v58 = vsel %vm1444_vm10, %v3204_v28, %v3202_v27  ;;  %v1449_v27 = vsel %vm1444_vm10, %v3216_v32, %v3214_v31 }
 0x286   : > { %2355 = vmatpush3.bf16.msra.mxu1 %v1338_v10 }
 0x287   : > { %2375 = vmatpush3.bf16.msra.mxu0 %v1446_v45  ;;  %v1315_v16 = vpop.permute.xlu1 %1314  ;;  %v1313_v11 = vpop.permute.xlu0 %1312  ;;  %2356 = vmatprep.subr.bf16.mxu1 %v2683_v2 }
 0x288   : > { %v1339_v17 = vsel %vm1336_vm9, %v1313_v11, %v1315_v16  ;;  %2376 = vmatprep.subr.bf16.mxu0 %v2683_v2 }
 0x289   : > { %1895 = vrot.lane.b32.xlu1 %v1856_v13, %s2689_s21  ;;  %1893 = vrot.lane.b32.xlu0 %v1855_v14, %s2689_s21 }
 0x28a   : > { %2357 = vmatpush3.bf16.msra.mxu1 %v1339_v17 }
 0x28b   : > { %2377 = vmatpush3.bf16.msra.mxu0 %v1447_v15  ;;  %v1319_v22 = vpop.permute.xlu1 %1318  ;;  %v1317_v18 = vpop.permute.xlu0 %1316  ;;  %2358 = vmatprep.subr.bf16.mxu1 %v2683_v2 }
 0x28c   : > { %v1340_v57 = vsel %vm1336_vm9, %v1317_v18, %v1319_v22  ;;  %2378 = vmatprep.subr.bf16.mxu0 %v2683_v2 }
 0x28d   : > { %1772 = vrot.lane.b32.xlu1 %v2995_v59, %s2688_s12  ;;  %1770 = vrot.lane.b32.xlu0 %v3001_v60, %s2688_s12  ;;  %v1450_v60 = vsel %vm1444_vm10, %v3228_v36, %v3226_v35 }
 0x28e   : > { %2359 = vmatpush3.bf16.msra.mxu1 %v1340_v57 }
 0x28f   : > { %2379 = vmatpush3.bf16.msra.mxu0 %v1448_v58  ;;  %v1323_v23 = vpop.permute.xlu1 %1322  ;;  %v1321_v24 = vpop.permute.xlu0 %1320  ;;  %2360 = vmatprep.subr.bf16.mxu1 %v2683_v2 }
 0x290   : > { %v1341_v25 = vsel %vm1336_vm9, %v1321_v24, %v1323_v23  ;;  %2380 = vmatprep.subr.bf16.mxu0 %v2683_v2 }
 0x291   : > { %1899 = vrot.lane.b32.xlu1 %v1858_v20, %s2689_s21  ;;  %1897 = vrot.lane.b32.xlu0 %v1857_v21, %s2689_s21 }
 0x292   : > { %2361 = vmatpush3.bf16.msra.mxu1 %v1341_v25 }
 0x293   : > { %2381 = vmatpush3.bf16.msra.mxu0 %v1449_v27  ;;  %v1327_v28 = vpop.permute.xlu1 %1326  ;;  %v1325_v26 = vpop.permute.xlu0 %1324  ;;  %2362 = vmatprep.subr.bf16.mxu1 %v2683_v2 }
 0x294   : > { %v1342_v59 = vsel %vm1336_vm9, %v1325_v26, %v1327_v28  ;;  %2382 = vmatprep.subr.bf16.mxu0 %v2683_v2 }
 0x295   : > { %1776 = vrot.lane.b32.xlu1 %v3003_v61, %s2688_s12  ;;  %1774 = vrot.lane.b32.xlu0 %v3009_v62, %s2688_s12 }
 0x296   : > { %2363 = vmatpush3.bf16.msra.mxu1 %v1342_v59 }
 0x297   : > { %2383 = vmatpush3.bf16.msra.mxu0 %v1450_v60  ;;  %v1331_v31 = vpop.permute.xlu1 %1330  ;;  %v1329_v32 = vpop.permute.xlu0 %1328  ;;  %2364 = vmatprep.subr.bf16.mxu1 %v2683_v2  ;;  %v1975_v60 = vld [vmem:[%s3645_s7] sm:$0xff] }
 0x298   : > { %v1343_v33 = vsel %vm1336_vm9, %v1329_v32, %v1331_v31  ;;  %2384 = vmatprep.subr.bf16.mxu0 %v2683_v2 }
 0x299   : > { %1903 = vrot.lane.b32.xlu1 %v1860_v29, %s2689_s21  ;;  %1901 = vrot.lane.b32.xlu0 %v1859_v30, %s2689_s21 }
 0x29a   : > { %2365 = vmatpush3.bf16.msra.mxu1 %v1343_v33 }
 0x29b   : > { %v1439_v35 = vpop.permute.xlu1 %1438  ;;  %v1437_v36 = vpop.permute.xlu0 %1436  ;;  %2366 = vmatprep.subr.bf16.mxu1 %v2683_v2 }
 0x29c   : > { %v1451_v34 = vsel %vm1444_vm10, %v1437_v36, %v1439_v35 }
 0x29d   : > { %1780 = vrot.lane.b32.xlu1 %v3011_v63, %s2688_s12  ;;  %1778 = vrot.lane.b32.xlu0 %v3017_v0, %s2688_s12  ;;  %v2200_v63 = vld [vmem:[%s3644_s6 + $0xc] sm:$0xf] }
 0x29e   : > { %2385 = vmatpush3.bf16.msra.mxu0 %v1451_v34 }
 0x29f   : > { %v1335_v61 = vpop.permute.xlu1 %1334  ;;  %v1333_v62 = vpop.permute.xlu0 %1332  ;;  %2386 = vmatprep.subr.bf16.mxu0 %v2683_v2 }
 0x2a0   : > { %v1344_v9 = vsel %vm1336_vm9, %v1333_v62, %v1335_v61  ;;  %v2202_v62 = vld [vmem:[%s3644_s6 + $0x14] sm:$0xf] }
 0x2a1   : > { %1907 = vrot.lane.b32.xlu1 %v1862_v37, %s2689_s21  ;;  %1905 = vrot.lane.b32.xlu0 %v1861_v38, %s2689_s21 }
 0x2a2   : > { %2367 = vmatpush3.bf16.msra.mxu1 %v1344_v9 }
 0x2a3   : > { %v1443_v39 = vpop.permute.xlu1 %1442  ;;  %v1441_v40 = vpop.permute.xlu0 %1440  ;;  %2392 = vmatprep.subr.bf16.mxu1 %v2683_v2 }
 0x2a4   : > { %v1452_v42 = vsel %vm1444_vm10, %v1441_v40, %v1443_v39  ;;  %v2203_v39 = vld [vmem:[%s3644_s6 + $0x18] sm:$0xf] }
 0x2a5   : > { %1784 = vrot.lane.b32.xlu1 %v3125_v41, %s2688_s12  ;;  %1782 = vrot.lane.b32.xlu0 %v3035_v3, %s2688_s12  ;;  %v2310_v41 = vpop.f32.mrb[1].mxu1 }
 0x2a6   : > { %2387 = vmatpush3.bf16.msra.mxu0 %v1452_v42  ;;  %2369 = vmatmul.mubr.bf16.vlgmr.msra.gmra.mrb[8].mxu1 %v2200_v63  ;;  %v1008_v3 = vpop.f32.mrb[2].mxu1 }
 0x2a7   : > { %v1542_v0 = vpop.permute.xlu1 %1541  ;;  %v1540_v12 = vpop.permute.xlu0 %1539  ;;  %2412 = vmatprep.subr.bf16.mxu0 %v2683_v2  ;;  %2408 = vmatprep.mubr.msk.bf16.mxu1 %vm2684_vm7, %v2683_v2 }
 0x2a8   : > { %v1572_v48 = vsel %vm1571_vm11, %v1540_v12, %v1542_v0  ;;  %v2311_v52 = vpop.f32.mrb[3].mxu1 }
 0x2a9   : > { %1911 = vrot.lane.b32.xlu1 %v1864_v43, %s2689_s21  ;;  %1909 = vrot.lane.b32.xlu0 %v1863_v44, %s2689_s21 }
 0x2aa   : > { %2393 = vmatpush3.bf16.msra.mxu1 %v1572_v48  ;;  %2389 = vmatmul.mubr.bf16.vlgmr.msra.gmra.mrb[36].mxu0 %v2201_v46 }
 0x2ab   : > { %v1669_v51 = vpop.permute.xlu1 %1668  ;;  %v1667_v55 = vpop.permute.xlu0 %1666  ;;  %2394 = vmatprep.subr.bf16.mxu1 %v2683_v2  ;;  %2428 = vmatprep.mubr.msk.bf16.mxu0 %vm2684_vm7, %v2683_v2 }
 0x2ac   : > { %v1699_v47 = vsel %vm1698_vm12, %v1667_v55, %v1669_v51 }
 0x2ad   : > { %1788 = vrot.lane.b32.xlu1 %v3140_v49, %s2688_s12  ;;  %1786 = vrot.lane.b32.xlu0 %v3039_v4, %s2688_s12  ;;  %s2583_s12 = scalar_lea.vmem %s2582_s28, 128 }
 0x2ae   : > { %2413 = vmatpush3.bf16.msra.mxu0 %v1699_v47  ;;  %p2585_p7 = scmp.lt.s32.totalorder %s2583_s12, %s2577_s22 }
 0x2af   : > { %v1546_v53 = vpop.permute.xlu1 %1545  ;;  %v1544_v54 = vpop.permute.xlu0 %1543  ;;  %2414 = vmatprep.subr.bf16.mxu0 %v2683_v2 }
 0x2b0   : > { %v1573_v7 = vsel %vm1571_vm11, %v1544_v54, %v1546_v53  ;;  %p2586_p9 = por %p2585_p7, %p2584_p6 }
 0x2b1   : > { %1915 = vrot.lane.b32.xlu1 %v1866_v5, %s2689_s21  ;;  %1913 = vrot.lane.b32.xlu0 %v1865_v6, %s2689_s21 }
 0x2b2   : > { %2395 = vmatpush3.bf16.msra.mxu1 %v1573_v7  ;;  %p2587_p10 = pnand %p2586_p9, %p2580_p5 }
 0x2b3   : > { %v1673_v56 = vpop.permute.xlu1 %1672  ;;  %v1671_v1 = vpop.permute.xlu0 %1670  ;;  %2396 = vmatprep.subr.bf16.mxu1 %v2683_v2 }
 0x2b4   : > { %v1700_v8 = vsel %vm1698_vm12, %v1671_v1, %v1673_v56 }
 0x2b5   : > { %2415 = vmatpush3.bf16.msra.mxu0 %v1700_v8  ;;  %1978 = vperm.xlu0 %2576, %v1975_v60  }
 0x2b6   : > { %2416 = vmatprep.subr.bf16.mxu0 %v2683_v2 }
 0x2b7   : > { %v1550_v49 = vpop.permute.xlu1 %1549  ;;  %v1548_v4 = vpop.permute.xlu0 %1547 }
 0x2b8   : > { %v1574_v19 = vsel %vm1571_vm11, %v1548_v4, %v1550_v49 }
 0x2b9   : > { %2397 = vmatpush3.bf16.msra.mxu1 %v1574_v19 }
 0x2ba   : > { %2398 = vmatprep.subr.bf16.mxu1 %v2683_v2 }
 0x2bb   : > { %v1677_v10 = vpop.permute.xlu1 %1676  ;;  %v1675_v45 = vpop.permute.xlu0 %1674 }
 0x2bc   : > { %v1701_v16 = vsel %vm1698_vm12, %v1675_v45, %v1677_v10 }
 0x2bd   : > { %2417 = vmatpush3.bf16.msra.mxu0 %v1701_v16 }
 0x2be   : > { %2418 = vmatprep.subr.bf16.mxu0 %v2683_v2 }
 0x2bf   : > { %v1554_v11 = vpop.permute.xlu1 %1553  ;;  %v1552_v13 = vpop.permute.xlu0 %1551 }
 0x2c0   : > { %v1575_v14 = vsel %vm1571_vm11, %v1552_v13, %v1554_v11 }
 0x2c1   : > { %2399 = vmatpush3.bf16.msra.mxu1 %v1575_v14 }
 0x2c2   : > { %2400 = vmatprep.subr.bf16.mxu1 %v2683_v2 }
 0x2c3   : > { %v1681_v17 = vpop.permute.xlu1 %1680  ;;  %v1679_v15 = vpop.permute.xlu0 %1678 }
 0x2c4   : > { %v1702_v22 = vsel %vm1698_vm12, %v1679_v15, %v1681_v17 }
 0x2c5   : > { %2419 = vmatpush3.bf16.msra.mxu0 %v1702_v22 }
 0x2c6   : > { %2420 = vmatprep.subr.bf16.mxu0 %v2683_v2 }
 0x2c7   : > { %v1558_v18 = vpop.permute.xlu1 %1557  ;;  %v1556_v57 = vpop.permute.xlu0 %1555 }
 0x2c8   : > { %v1576_v58 = vsel %vm1571_vm11, %v1556_v57, %v1558_v18 }
 0x2c9   : > { %2401 = vmatpush3.bf16.msra.mxu1 %v1576_v58 }
 0x2ca   : > { %2402 = vmatprep.subr.bf16.mxu1 %v2683_v2 }
 0x2cb   : > { %v1685_v23 = vpop.permute.xlu1 %1684  ;;  %v1683_v24 = vpop.permute.xlu0 %1682 }
 0x2cc   : > { %v1703_v20 = vsel %vm1698_vm12, %v1683_v24, %v1685_v23 }
 0x2cd   : > { %2421 = vmatpush3.bf16.msra.mxu0 %v1703_v20 }
 0x2ce   : > { %2422 = vmatprep.subr.bf16.mxu0 %v2683_v2 }
 0x2cf   : > { %v1562_v21 = vpop.permute.xlu1 %1561  ;;  %v1560_v25 = vpop.permute.xlu0 %1559 }
 0x2d0   : > { %v1577_v27 = vsel %vm1571_vm11, %v1560_v25, %v1562_v21 }
 0x2d1   : > { %2403 = vmatpush3.bf16.msra.mxu1 %v1577_v27 }
 0x2d2   : > { %2404 = vmatprep.subr.bf16.mxu1 %v2683_v2 }
 0x2d3   : > { %v1689_v28 = vpop.permute.xlu1 %1688  ;;  %v1687_v26 = vpop.permute.xlu0 %1686 }
 0x2d4   : > { %v1704_v59 = vsel %vm1698_vm12, %v1687_v26, %v1689_v28  ;;  %v2204_v26 = vld [vmem:[%s3644_s6 + $0x1c] sm:$0xf] }
 0x2d5   : > { %2423 = vmatpush3.bf16.msra.mxu0 %v1704_v59 }
 0x2d6   : > { %2424 = vmatprep.subr.bf16.mxu0 %v2683_v2 }
 0x2d7   : > { %v1566_v31 = vpop.permute.xlu1 %1565  ;;  %v1564_v32 = vpop.permute.xlu0 %1563 }
 0x2d8   : > { %v1578_v29 = vsel %vm1571_vm11, %v1564_v32, %v1566_v31  ;;  %v2205_v32 = vld [vmem:[%s3644_s6 + $0x20] sm:$0xf] }
 0x2d9   : > { %2405 = vmatpush3.bf16.msra.mxu1 %v1578_v29 }
 0x2da   : > { %2406 = vmatprep.subr.bf16.mxu1 %v2683_v2 }
 0x2db   : > { %v1693_v30 = vpop.permute.xlu1 %1692  ;;  %v1691_v33 = vpop.permute.xlu0 %1690 }
 0x2dc   : > { %v1705_v35 = vsel %vm1698_vm12, %v1691_v33, %v1693_v30 }
 0x2dd   : > { %2425 = vmatpush3.bf16.msra.mxu0 %v1705_v35 }
 0x2de   : > { %2426 = vmatprep.subr.bf16.mxu0 %v2683_v2 }
 0x2df   : > { %v1570_v36 = vpop.permute.xlu1 %1569  ;;  %v1568_v34 = vpop.permute.xlu0 %1567 }
 0x2e0   : > { %v1579_v61 = vsel %vm1571_vm11, %v1568_v34, %v1570_v36 }
 0x2e1   : > { %2407 = vmatpush3.bf16.msra.mxu1 %v1579_v61 }
 0x2e2   : > { %2432 = vmatprep.subr.bf16.mxu1 %v2683_v2 }
 0x2e3   : > { %v1697_v37 = vpop.permute.xlu1 %1696  ;;  %v1695_v38 = vpop.permute.xlu0 %1694 }
 0x2e4   : > { %v1706_v9 = vsel %vm1698_vm12, %v1695_v38, %v1697_v37  ;;  %2409 = vmatmul.mubr.bf16.vlgmr.msra.gmra.mrb[12].mxu1 %v2202_v62 }
 0x2e5   : > { %2427 = vmatpush3.bf16.msra.mxu0 %v1706_v9  ;;  %2448 = vmatprep.mubr.msk.bf16.mxu1 %vm2684_vm7, %v2683_v2 }
 0x2e6   : > { %2452 = vmatprep.subr.bf16.mxu0 %v2683_v2 }
 0x2e7   : > { %v1761_v40 = vpop.permute.xlu1 %1760  ;;  %v1759_v63 = vpop.permute.xlu0 %1758 }
 0x2e8   : > { %v1791_v42 = vsel %vm1790_vm13, %v1759_v63, %v1761_v40  ;;  %2429 = vmatmul.mubr.bf16.vlgmr.msra.gmra.mrb[40].mxu0 %v2203_v39 }
 0x2e9   : > { %2433 = vmatpush3.bf16.msra.mxu1 %v1791_v42  ;;  %2468 = vmatprep.mubr.msk.bf16.mxu0 %vm2684_vm7, %v2683_v2 }
 0x2ea   : > { %2434 = vmatprep.subr.bf16.mxu1 %v2683_v2 }
 0x2eb   : > { %v1888_v0 = vpop.permute.xlu1 %1887  ;;  %v1886_v12 = vpop.permute.xlu0 %1885 }
 0x2ec   : > { %v1918_v43 = vsel %vm1917_vm14, %v1886_v12, %v1888_v0 }
 0x2ed   : > { %2453 = vmatpush3.bf16.msra.mxu0 %v1918_v43 }
 0x2ee   : > { %2454 = vmatprep.subr.bf16.mxu0 %v2683_v2 }
 0x2ef   : > { %v1765_v44 = vpop.permute.xlu1 %1764  ;;  %v1763_v46 = vpop.permute.xlu0 %1762 }
 0x2f0   : > { %v1792_v48 = vsel %vm1790_vm13, %v1763_v46, %v1765_v44 }
 0x2f1   : > { %2435 = vmatpush3.bf16.msra.mxu1 %v1792_v48 }
 0x2f2   : > { %2436 = vmatprep.subr.bf16.mxu1 %v2683_v2 }
 0x2f3   : > { %v1892_v41 = vpop.permute.xlu1 %1891  ;;  %v1890_v3 = vpop.permute.xlu0 %1889 }
 0x2f4   : > { %v1919_v51 = vsel %vm1917_vm14, %v1890_v3, %v1892_v41 }
 0x2f5   : > { %2455 = vmatpush3.bf16.msra.mxu0 %v1919_v51 }
 0x2f6   : > { %2456 = vmatprep.subr.bf16.mxu0 %v2683_v2 }
 0x2f7   : > { %v1769_v55 = vpop.permute.xlu1 %1768  ;;  %v1767_v47 = vpop.permute.xlu0 %1766 }
 0x2f8   : > { %v1793_v52 = vsel %vm1790_vm13, %v1767_v47, %v1769_v55 }
 0x2f9   : > { %2437 = vmatpush3.bf16.msra.mxu1 %v1793_v52 }
 0x2fa   : > { %2438 = vmatprep.subr.bf16.mxu1 %v2683_v2 }
 0x2fb   : > { %v1896_v53 = vpop.permute.xlu1 %1895  ;;  %v1894_v54 = vpop.permute.xlu0 %1893 }
 0x2fc   : > { %v1920_v5 = vsel %vm1917_vm14, %v1894_v54, %v1896_v53 }
 0x2fd   : > { %2457 = vmatpush3.bf16.msra.mxu0 %v1920_v5 }
 0x2fe   : > { %2458 = vmatprep.subr.bf16.mxu0 %v2683_v2 }
 0x2ff   : > { %v1773_v6 = vpop.permute.xlu1 %1772  ;;  %v1771_v7 = vpop.permute.xlu0 %1770 }
 0x300   : > { %v1794_v56 = vsel %vm1790_vm13, %v1771_v7, %v1773_v6 }
 0x301   : > { %2439 = vmatpush3.bf16.msra.mxu1 %v1794_v56 }
 0x302   : > { %2440 = vmatprep.subr.bf16.mxu1 %v2683_v2 }
 0x303   : > { %v1900_v1 = vpop.permute.xlu1 %1899  ;;  %v1898_v8 = vpop.permute.xlu0 %1897 }
 0x304   : > { %v1921_v49 = vsel %vm1917_vm14, %v1898_v8, %v1900_v1 }
 0x305   : > { %2459 = vmatpush3.bf16.msra.mxu0 %v1921_v49 }
 0x306   : > { %2460 = vmatprep.subr.bf16.mxu0 %v2683_v2 }
 0x307   : > { %v1777_v4 = vpop.permute.xlu1 %1776  ;;  %v1775_v19 = vpop.permute.xlu0 %1774 }
 0x308   : > { %v1795_v10 = vsel %vm1790_vm13, %v1775_v19, %v1777_v4 }
 0x309   : > { %2441 = vmatpush3.bf16.msra.mxu1 %v1795_v10 }
 0x30a   : > { %2442 = vmatprep.subr.bf16.mxu1 %v2683_v2 }
 0x30b   : > { %v1904_v45 = vpop.permute.xlu1 %1903  ;;  %v1902_v16 = vpop.permute.xlu0 %1901 }
 0x30c   : > { %v1922_v11 = vsel %vm1917_vm14, %v1902_v16, %v1904_v45 }
 0x30d   : > { %2461 = vmatpush3.bf16.msra.mxu0 %v1922_v11 }
 0x30e   : > { %2462 = vmatprep.subr.bf16.mxu0 %v2683_v2 }
 0x30f   : > { %v1781_v13 = vpop.permute.xlu1 %1780  ;;  %v1779_v14 = vpop.permute.xlu0 %1778 }
 0x310   : > { %v1796_v17 = vsel %vm1790_vm13, %v1779_v14, %v1781_v13 }
 0x311   : > { %2443 = vmatpush3.bf16.msra.mxu1 %v1796_v17 }
 0x312   : > { %2444 = vmatprep.subr.bf16.mxu1 %v2683_v2 }
 0x313   : > { %v1908_v15 = vpop.permute.xlu1 %1907  ;;  %v1906_v22 = vpop.permute.xlu0 %1905 }
 0x314   : > { %v1923_v18 = vsel %vm1917_vm14, %v1906_v22, %v1908_v15 }
 0x315   : > { %2463 = vmatpush3.bf16.msra.mxu0 %v1923_v18 }
 0x316   : > { %2464 = vmatprep.subr.bf16.mxu0 %v2683_v2 }
 0x317   : > { %v1785_v57 = vpop.permute.xlu1 %1784  ;;  %v1783_v58 = vpop.permute.xlu0 %1782 }
 0x318   : > { %v1797_v23 = vsel %vm1790_vm13, %v1783_v58, %v1785_v57 }
 0x319   : > { %2445 = vmatpush3.bf16.msra.mxu1 %v1797_v23 }
 0x31a   : > { %2446 = vmatprep.subr.bf16.mxu1 %v2683_v2 }
 0x31b   : > { %v1912_v24 = vpop.permute.xlu1 %1911  ;;  %v1910_v20 = vpop.permute.xlu0 %1909 }
 0x31c   : > { %v1924_v21 = vsel %vm1917_vm14, %v1910_v20, %v1912_v24 }
 0x31d   : > { %2465 = vmatpush3.bf16.msra.mxu0 %v1924_v21 }
 0x31e   : > { %2466 = vmatprep.subr.bf16.mxu0 %v2683_v2 }
 0x31f   : > { %v1789_v25 = vpop.permute.xlu1 %1788  ;;  %v1787_v27 = vpop.permute.xlu0 %1786 }
 0x320   : > { %v1798_v28 = vsel %vm1790_vm13, %v1787_v27, %v1789_v25 }
 0x321   : > { %2447 = vmatpush3.bf16.msra.mxu1 %v1798_v28 }
 0x323   : > { %v1916_v59 = vpop.permute.xlu1 %1915  ;;  %v1914_v60 = vpop.permute.xlu0 %1913 }
 0x324   : > { %v1925_v31 = vsel %vm1917_vm14, %v1914_v60, %v1916_v59  ;;  %2449 = vmatmul.mubr.bf16.vlgmr.msra.gmra.mrb[16].mxu1 %v2204_v26 }
 0x325   : > { %2467 = vmatpush3.bf16.msra.mxu0 %v1925_v31 }
 0x328   : > { %2469 = vmatmul.mubr.bf16.vlgmr.msra.gmra.mrb[44].mxu0 %v2205_v32 }
 0x334   : > { %v1979_v8 = vpop.permute.xlu0 %1978 }
 0x351   : > { %v1110_v2 = vpop.f32.mrb[4].mxu1 }
 0x352   : > { %v1111_v29 = vadd.f32 %v1110_v2, %v3477_v50  ;;  %v2330_v30 = vpop.f32.mrb[5].mxu1 }
 0x353   : > { %v1113_v33 = vpop.f32.mrb[6].mxu1 }
 0x354   : > { %v2331_v35 = vpop.f32.mrb[7].mxu1 }
 0x355   : > { %v1260_v36 = vpop.f32.mrb[32].mxu0 }
 0x356   : > { %v1266_v34 = vadd.f32 %v1260_v36, %v1111_v29  ;;  %v2350_v61 = vpop.f32.mrb[33].mxu0 }
 0x357   : > { %v1263_v62 = vpop.f32.mrb[34].mxu0 }
 0x358   : > { %v2351_v37 = vpop.f32.mrb[35].mxu0 }
 0x379   : > { %v1387_v38 = vpop.f32.mrb[8].mxu1 }
 0x37a   : > { %v1393_v9 = vadd.f32 %v1387_v38, %v1266_v34  ;;  %v2370_v39 = vpop.f32.mrb[9].mxu1 }
 0x37b   : > { %v1390_v40 = vpop.f32.mrb[10].mxu1 }
 0x37c   : > { %v2371_v63 = vpop.f32.mrb[11].mxu1 }
 0x37d   : > { %v1495_v42 = vpop.f32.mrb[36].mxu0 }
 0x37e   : > { %v1501_v0 = vadd.f32 %v1495_v42, %v1393_v9  ;;  %v2390_v12 = vpop.f32.mrb[37].mxu0 }
 0x37f   : > { %v1498_v43 = vpop.f32.mrb[38].mxu0 }
 0x380   : > { %v2391_v44 = vpop.f32.mrb[39].mxu0 }
 0x3b7   : > { %v1622_v50 = vpop.f32.mrb[12].mxu1 }
 0x3b8   : > { %v1628_v46 = vadd.f32 %v1622_v50, %v1501_v0  ;;  %v2410_v48 = vpop.f32.mrb[13].mxu1 }
 0x3b9   : > { %v1625_v41 = vpop.f32.mrb[14].mxu1 }
 0x3ba   : > { %v2411_v3 = vpop.f32.mrb[15].mxu1 }
 0x3bb   : > { %v1749_v51 = vpop.f32.mrb[40].mxu0 }
 0x3bc   : > { %v1755_v55 = vadd.f32 %v1749_v51, %v1628_v46  ;;  %v2430_v47 = vpop.f32.mrb[41].mxu0 }
 0x3bd   : > { %v1752_v52 = vpop.f32.mrb[42].mxu0 }
 0x3be   : > { %v2431_v53 = vpop.f32.mrb[43].mxu0 }
 0x3f7   : > { %v1841_v54 = vpop.f32.mrb[16].mxu1 }
 0x3f8   : > { %v1847_v5 = vadd.f32 %v1841_v54, %v1755_v55  ;;  %v2450_v6 = vpop.f32.mrb[17].mxu1 }
 0x3f9   : > { %v1844_v7 = vpop.f32.mrb[18].mxu1 }
 0x3fa   : > { %v2451_v56 = vpop.f32.mrb[19].mxu1 }
 0x3fb   : > { %v1968_v1 = vpop.f32.mrb[44].mxu0 }
 0x3fc   : > { %v1974_v49 = vadd.f32 %v1968_v1, %v1847_v5  ;;  %v2470_v4 = vpop.f32.mrb[45].mxu0 }
 0x3fd   : > { %v1971_v19 = vpop.f32.mrb[46].mxu0 }
 0x3fe   : > { %v1981_v10 = vadd.f32 %v1979_v8, %v1974_v49  ;;  %v2471_v45 = vpop.f32.mrb[47].mxu0 }
 0x400   : > { %v1982_v16 = vpack.c.bf16 %v1981_v10, %v1981_v10 }
 0x402   : > { %1983 = vst [vmem:[%s423_s29] sm:$0xf] %v1982_v16 }
 0x403   : > { %2590 = shalt.err (!%p2587_p10)
}
 0x404   : > { %s2591_s25 = scalar_lea.hbm %s3581_s13, 64  ;;  %s2595_s23 = scalar_lea.hbm %s3675_s27, 256 }
 0x405   : > { %p2592_p11 = scmp.ne.s32.totalorder %s3581_s13, %s2591_s25  ;;  %p2596_p0 = scmp.lt.u32.totalorder %s3581_s13, %s3675_s27 }
 0x406   : > { %p2597_p1 = scmp.lt.u32.totalorder %s2595_s23, %s2591_s25  ;;  %p2599_p4 = scmp.lt.u32.totalorder %s2591_s25, %s3581_s13 }
 0x407   : > { %p2593_p12 = pnand %p2592_p11, %p2797_p3 }
 0x408   : > { %p2598_p2 = por %p2597_p1, %p2596_p0 }
 0x409   : > { %p2594_p13 = pneg %p2593_p12 }
 0x40a   : > { %p2600_p5 = por %p2599_p4, %p2598_p2 }
 0x40c   : > { %p2601_p6 = pnand %p2600_p5, %p2594_p13 }
 0x40e   : > { %2604 = shalt.err (!%p2601_p6)
}
 0x40f   : > { %2472 = dma.vmem_to_hbm [thread:$0]  (%p2797_p3), %s3583_s18, 64, %s3581_s13, %s1985_s11  }
 0x410 PF: > { %s3677_s15 = sld [smem:[#allocation10_spill]]  ;;  %s3678_s9 = sld [smem:[#allocation6_spill]] }
 0x416   : > { %p2478_p7 = scmp.ge.s32.totalorder %s3677_s15, 2  ;;  %s2023_s19 = sand.u32 1, %s3678_s9  }
 0x417   : > { %s2024_s20 = scalar_lea.sflag [#allocation4], %s2023_s19 }
 0x418   : > { %p2475_p9 = pnand %p2478_p7, %p2806_p8 }
 0x41a   : > { %2638 = dma.done.wait (!%p2475_p9), %s2024_s20, 64  }
 0x41b   : > { %2640 = vsyncadd (!%p2475_p9), %s2024_s20, 4294967232  ;;  %s24_s20 = sadd.s32 1, %s3677_s15   ;;  %s3680_s16 = sld [smem:[#allocation7_spill]] }
 0x41c   : > { %p21_p10 = scmp.ge.s32.totalorder %s24_s20, 6   ;;  %s3681_s15 = sld [smem:[#allocation14_spill]] }
 0x41d   : > { %s3682_s26 = sld [smem:[#allocation8_spill]]  ;;  %s3683_s17 = sld [smem:[#allocation9_spill]] }
 0x41e   : > { %s3684_s18 = sld [smem:[#allocation11_spill]]  ;;  %s3685_s19 = sld [smem:[#allocation12_spill]] }
 0x41f   : > { %s3686_s13 = smov %s2647_s14  ;;  %23 = sbr.rel (!%p21_p10) target bundleno = 8 (0x8), region = 125 }
 0x421   : > { %s3687_s14 = smov %s3680_s16 }
 0x423   : > { %s3688_s16 = smov %s3682_s26 }
 0x426   :  { %2040 = vsyncpa [#allocation4], 1 }
 0x427   :  { %2042 = vsyncpa [#allocation4 + $0x1], 1 }

</bundles_post_ra>
